<compile_context>
chip_gen: v7x
topology: tpu7x:2x2x1
jax: 0.10.0
libtpu: 0.0.40
codegen_flags: <defaults>
</compile_context>

<pallas_src>
import jax
import jax.numpy as jnp
from jax import lax
from jax.experimental import pallas as pl
from jax.experimental.pallas import tpu as pltpu

# ----- module hyper-parameters (ODEFunc.__init__ args) -----
M, K, A = 6, 4, 3
LAYER_SIZES = [128, 128]
H = LAYER_SIZES[0]            # both hidden layers are 128 wide
D_IN = M + A + 1 + K          # 14 : net input dim, order [x | a | t | v]
D_OUT = M + A                 # 9  : net output dim
D_XAV = M + A + K             # 13 : state vector fed to forward()

DP = 128                      # padded lane width
T_LANE = D_XAV                # lane 13 holds t (baked in by the wrapper)
ONE_LANE = D_XAV + 1          # lane 14 holds the constant 1 (bias fold)

BATCH = 128                   # rows per RHS evaluation
N_STEPS = 8                   # RHS evaluations fused into one pallas_call
N_CORES = 2                   # row-split for v7x's two TensorCores


# --------------- Pallas kernel: fused 3-layer MLP over a big row block ---------------
def ode_rhs_kernel(xav_ref, w1_ref, w2_ref, b2_ref, w3_ref, b3_ref, o_ref):
    # xav_ref: [rows, 128] bf16 with lanes [x|a|v|t|1|0...]; b1 folded into w1 row ONE_LANE.
    h = jnp.dot(xav_ref[...], w1_ref[...], preferred_element_type=jnp.float32)
    h = jnp.tanh(h.astype(jnp.bfloat16))                       # bf16 tanh -> feeds next MXU pass
    h = jnp.dot(h, w2_ref[...], preferred_element_type=jnp.float32)
    h = jnp.tanh((h + b2_ref[...]).astype(jnp.bfloat16))       # f32 bias add, bf16 tanh
    o = jnp.dot(h, w3_ref[...], preferred_element_type=jnp.float32)
    # output cols >= D_OUT have zero weight & bias -> dv block (and lane padding)
    # is exactly zero in the stored tile.
    o_ref[...] = (o + b3_ref[...]).astype(o_ref.dtype)


def ode_func_forward_padded(xav_packed, kparams):
    """Hot path. xav_packed: [R, 128] bf16 padded state (t in lane 13, 1 in lane 14).
    Returns [R, 128] bf16: lanes 0..8 = dx|da, all other lanes exactly 0."""
    w1, w2, b2, w3, b3 = kparams
    R, dp = xav_packed.shape
    assert dp == DP and R % (N_CORES * 8) == 0
    rows = R // N_CORES

    flops = 2 * R * (DP * H + H * H + H * DP)
    bytes_accessed = ((w1.size + w2.size + w3.size) * 2         # bf16 weights
                      + (b2.size + b3.size) * 4                 # f32 biases
                      + 2 * R * DP * 2)                         # bf16 activations in + out

    return pl.pallas_call(
        ode_rhs_kernel,
        out_shape=jax.ShapeDtypeStruct((R, DP), jnp.bfloat16),
        grid_spec=pltpu.PrefetchScalarGridSpec(
            num_scalar_prefetch=0,
            grid=(N_CORES,),                                     # row split, not step split
            in_specs=[
                pl.BlockSpec((rows, DP), lambda i: (i, 0)),      # packed state (per-core rows)
                pl.BlockSpec((DP, H), lambda i: (0, 0)),         # w1  (VMEM-resident, bf16)
                pl.BlockSpec((H, H), lambda i: (0, 0)),          # w2  (VMEM-resident, bf16)
                pl.BlockSpec((1, H), lambda i: (0, 0)),          # b2  (VMEM-resident, f32)
                pl.BlockSpec((H, DP), lambda i: (0, 0)),         # w3  (VMEM-resident, bf16)
                pl.BlockSpec((1, DP), lambda i: (0, 0)),         # b3  (VMEM-resident, f32)
            ],
            out_specs=pl.BlockSpec((rows, DP), lambda i: (i, 0)),
        ),
        compiler_params=pltpu.CompilerParams(
            dimension_semantics=("parallel",)),                  # v7x: both TCs, one half each
        cost_estimate=pl.CostEstimate(
            flops=flops,
            transcendentals=2 * R * H,
            bytes_accessed=bytes_accessed),
    )(xav_packed, w1, w2, b2, w3, b3)


# ----------------- one-time packing / unpacking (outside the hot path) -----------------
def pack_state(t_steps, xav_steps):
    """Pack (S, B, 13) states + (S,) times into the kernel's (S*B, 128) bf16 layout."""
    S, B, d = xav_steps.shape
    assert d == D_XAV
    pad = jnp.zeros((S, B, DP), jnp.float32)
    pad = pad.at[:, :, :D_XAV].set(xav_steps.astype(jnp.float32))          # lanes 0..12 = x|a|v
    pad = pad.at[:, :, T_LANE].set(jnp.broadcast_to(t_steps[:, None], (S, B)))  # lane 13 = t
    pad = pad.at[:, :, ONE_LANE].set(1.0)                                  # lane 14 = 1
    return pad.reshape(S * B, DP).astype(jnp.bfloat16)


def unpack_output(out_packed, S, B):
    """Drop lane padding: (S*B, 128) -> (S, B, 13).  Lanes >= D_OUT are exactly zero."""
    return out_packed.reshape(S, B, DP)[:, :, :D_XAV]


# ----------------- parameter construction (deterministic) -----------------
def init_logical_params(key):
    """Logical (unpadded, f32) parameters; weights stored [in, out]."""
    def xavier(k, fan_in, fan_out):
        limit = jnp.sqrt(6.0 / (fan_in + fan_out))
        return jax.random.uniform(k, (fan_in, fan_out), jnp.float32, -limit, limit)

    k1, k2, k3 = jax.random.split(key, 3)
    W1 = xavier(k1, D_IN, LAYER_SIZES[0])
    b1 = jnp.zeros((LAYER_SIZES[0],), jnp.float32)      # nn.init.constant_(bias, 0)
    W2 = xavier(k2, LAYER_SIZES[0], LAYER_SIZES[1])
    b2 = jnp.zeros((LAYER_SIZES[1],), jnp.float32)
    W3 = xavier(k3, LAYER_SIZES[1], D_OUT)
    b3 = jnp.zeros((D_OUT,), jnp.float32)
    return (W1, b1, W2, b2, W3, b3)


def make_kernel_params(logical):
    """Pack logical params into the kernel layout:
       - W1 rows permuted from [x,a,t,v] order to kernel lane order [x,a,v,t],
         plus a bias row at ONE_LANE, zero-padded to 128 rows, cast to bf16.
       - W3 columns / b3 zero-padded to 128 (gives the exact-zero dv block)."""
    W1, b1, W2, b2, W3, b3 = logical
    w1_perm = jnp.concatenate(
        [W1[:M + A],                    # rows for x, a   -> lanes 0..8
         W1[M + A + 1:D_IN],            # rows for v      -> lanes 9..12
         W1[M + A:M + A + 1],           # row for t       -> lane 13
         b1.reshape(1, -1)],            # bias row        -> lane 14
        axis=0)
    w1_pad = jnp.zeros((DP, H), jnp.float32).at[:D_IN + 1].set(w1_perm)
    w3_pad = jnp.zeros((H, DP), jnp.float32).at[:, :D_OUT].set(W3)
    b3_pad = jnp.zeros((1, DP), jnp.float32).at[:, :D_OUT].set(b3.reshape(1, -1))
    return (w1_pad.astype(jnp.bfloat16),
            W2.astype(jnp.bfloat16),
            b2.reshape(1, -1).astype(jnp.float32),
            w3_pad.astype(jnp.bfloat16),
            b3_pad)


# ----------------- pure-JAX f32 reference (torch semantics) -----------------
def ode_func_forward_ref(t, xav, logical):
    W1, b1, W2, b2, W3, b3 = logical
    B = xav.shape[0]
    x = xav[:, :M]
    a = xav[:, M:M + A]
    v = xav[:, M + A:]
    t_expanded = jnp.broadcast_to(jnp.reshape(t, (1, 1)), (B, 1)).astype(xav.dtype)
    inp = jnp.concatenate([x, a, t_expanded, v], axis=-1)
    h = jnp.tanh(inp @ W1 + b1)
    h = jnp.tanh(h @ W2 + b2)
    dx_da = h @ W3 + b3
    return jnp.concatenate([dx_da, jnp.zeros_like(v)], axis=-1)


if __name__ == "__main__":
    key = jax.random.PRNGKey(0)
    kp, kx, kt = jax.random.split(key, 3)

    logical = init_logical_params(kp)
    kparams = make_kernel_params(logical)

    xav_steps = jax.random.normal(kx, (N_STEPS, BATCH, D_XAV), jnp.float32)
    t_steps = jax.random.normal(kt, (N_STEPS,), jnp.float32)

    # one-time packing into the kernel's padded layout (an integrator would stay padded)
    xav_packed = pack_state(t_steps, xav_steps)

    fwd = jax.jit(lambda xp: ode_func_forward_padded(xp, kparams))
    out_packed = jax.block_until_ready(fwd(xav_packed))

    out = unpack_output(out_packed.astype(jnp.float32), N_STEPS, BATCH)
    ref = jnp.stack([ode_func_forward_ref(t_steps[i], xav_steps[i], logical)
                     for i in range(N_STEPS)])

    assert out_packed.shape == (N_STEPS * BATCH, DP)
    assert out.shape == (N_STEPS, BATCH, D_XAV)
    # bf16 weights/activations/output vs. the f32 reference -> loosened tolerance
    assert jnp.allclose(out, ref, atol=5e-2, rtol=5e-2)
    # dv block and all padding lanes must be exactly zero (zero-padded W3 cols / b3)
    assert bool(jnp.all(out[:, :, M + A:] == 0.0))
    assert bool(jnp.all(out_packed.reshape(N_STEPS, BATCH, DP)[:, :, D_OUT:] == 0.0))

    print("KERNEL_OK")
</pallas_src>

<mosaic_0001>
module attributes {stable_mosaic.version = 11 : i64} {
  func.func @ode_rhs_kernel(%arg0: i32, %arg1: memref<512x128xbf16, #tpu.memory_space<vmem>>, %arg2: memref<128x128xbf16, #tpu.memory_space<vmem>>, %arg3: memref<128x128xbf16, #tpu.memory_space<vmem>>, %arg4: memref<1x128xf32, #tpu.memory_space<vmem>>, %arg5: memref<128x128xbf16, #tpu.memory_space<vmem>>, %arg6: memref<1x128xf32, #tpu.memory_space<vmem>>, %arg7: memref<512x128xbf16, #tpu.memory_space<vmem>>) attributes {dimension_semantics = [#tpu.dimension_semantics<parallel>], iteration_bounds = array<i64: 2>, scalar_prefetch = 0 : i64, scratch_operands = 0 : i64, tpu.core_type = #tpu.core_type<tc>, window_params = [{transform_indices = @transform_0, window_bounds = array<i64: 512, 128>}, {pipeline_mode = #tpu.pipeline_mode<synchronous>, transform_indices = @transform_1, window_bounds = array<i64: 128, 128>}, {pipeline_mode = #tpu.pipeline_mode<synchronous>, transform_indices = @transform_2, window_bounds = array<i64: 128, 128>}, {pipeline_mode = #tpu.pipeline_mode<synchronous>, transform_indices = @transform_3, window_bounds = array<i64: 1, 128>}, {pipeline_mode = #tpu.pipeline_mode<synchronous>, transform_indices = @transform_4, window_bounds = array<i64: 128, 128>}, {pipeline_mode = #tpu.pipeline_mode<synchronous>, transform_indices = @transform_5, window_bounds = array<i64: 1, 128>}, {transform_indices = @transform_6, window_bounds = array<i64: 512, 128>}]} {
    %c0 = arith.constant 0 : index
    %c0_0 = arith.constant 0 : index
    %0 = vector.load %arg1[%c0, %c0_0] : memref<512x128xbf16, #tpu.memory_space<vmem>>, vector<512x128xbf16>
    %c0_1 = arith.constant 0 : index
    %c0_2 = arith.constant 0 : index
    %1 = vector.load %arg2[%c0_1, %c0_2] : memref<128x128xbf16, #tpu.memory_space<vmem>>, vector<128x128xbf16>
    %cst = arith.constant dense<0.000000e+00> : vector<512x128xf32>
    %2 = tpu.matmul %0, %1, %cst {dimension_numbers = #tpu.dot_dimension_numbers<[1], [0], [0], [1], [0, 0, 1, 1], [], []>} : vector<512x128xbf16>, vector<128x128xbf16>, vector<512x128xf32> -> vector<512x128xf32>
    %3 = arith.truncf %2 : vector<512x128xf32> to vector<512x128xbf16>
    %4 = math.tanh %3 : vector<512x128xbf16>
    %c0_3 = arith.constant 0 : index
    %c0_4 = arith.constant 0 : index
    %5 = vector.load %arg3[%c0_3, %c0_4] : memref<128x128xbf16, #tpu.memory_space<vmem>>, vector<128x128xbf16>
    %cst_5 = arith.constant dense<0.000000e+00> : vector<512x128xf32>
    %6 = tpu.matmul %4, %5, %cst_5 {dimension_numbers = #tpu.dot_dimension_numbers<[1], [0], [0], [1], [0, 0, 1, 1], [], []>} : vector<512x128xbf16>, vector<128x128xbf16>, vector<512x128xf32> -> vector<512x128xf32>
    %c0_6 = arith.constant 0 : index
    %c0_7 = arith.constant 0 : index
    %7 = vector.load %arg4[%c0_6, %c0_7] : memref<1x128xf32, #tpu.memory_space<vmem>>, vector<1x128xf32>
    %8 = vector.broadcast %7 : vector<1x128xf32> to vector<512x128xf32>
    %9 = arith.addf %6, %8 : vector<512x128xf32>
    %10 = arith.truncf %9 : vector<512x128xf32> to vector<512x128xbf16>
    %11 = math.tanh %10 : vector<512x128xbf16>
    %c0_8 = arith.constant 0 : index
    %c0_9 = arith.constant 0 : index
    %12 = vector.load %arg5[%c0_8, %c0_9] : memref<128x128xbf16, #tpu.memory_space<vmem>>, vector<128x128xbf16>
    %cst_10 = arith.constant dense<0.000000e+00> : vector<512x128xf32>
    %13 = tpu.matmul %11, %12, %cst_10 {dimension_numbers = #tpu.dot_dimension_numbers<[1], [0], [0], [1], [0, 0, 1, 1], [], []>} : vector<512x128xbf16>, vector<128x128xbf16>, vector<512x128xf32> -> vector<512x128xf32>
    %c0_11 = arith.constant 0 : index
    %c0_12 = arith.constant 0 : index
    %14 = vector.load %arg6[%c0_11, %c0_12] : memref<1x128xf32, #tpu.memory_space<vmem>>, vector<1x128xf32>
    %15 = vector.broadcast %14 : vector<1x128xf32> to vector<512x128xf32>
    %16 = arith.addf %13, %15 : vector<512x128xf32>
    %17 = arith.truncf %16 : vector<512x128xf32> to vector<512x128xbf16>
    %c0_13 = arith.constant 0 : index
    %c0_14 = arith.constant 0 : index
    %18 = vector.load %arg7[%c0_13, %c0_14] : memref<512x128xbf16, #tpu.memory_space<vmem>>, vector<512x128xbf16>
    tpu.vector_store %arg7[%c0_13, %c0_14], %17 {strides = array<i32>} : memref<512x128xbf16, #tpu.memory_space<vmem>>, vector<512x128xbf16>,
    return
  }
  func.func @transform_0(%arg0: i32) -> (i32, i32) {
    %c0_i32 = arith.constant 0 : i32
    %c0_i32_0 = arith.constant 0 : i32
    return %arg0, %c0_i32 : i32, i32
  }
  func.func @transform_1(%arg0: i32) -> (i32, i32) {
    %c0_i32 = arith.constant 0 : i32
    %c0_i32_0 = arith.constant 0 : i32
    %c0_i32_1 = arith.constant 0 : i32
    return %c0_i32, %c0_i32_0 : i32, i32
  }
  func.func @transform_2(%arg0: i32) -> (i32, i32) {
    %c0_i32 = arith.constant 0 : i32
    %c0_i32_0 = arith.constant 0 : i32
    %c0_i32_1 = arith.constant 0 : i32
    return %c0_i32, %c0_i32_0 : i32, i32
  }
  func.func @transform_3(%arg0: i32) -> (i32, i32) {
    %c0_i32 = arith.constant 0 : i32
    %c0_i32_0 = arith.constant 0 : i32
    %c0_i32_1 = arith.constant 0 : i32
    return %c0_i32, %c0_i32_0 : i32, i32
  }
  func.func @transform_4(%arg0: i32) -> (i32, i32) {
    %c0_i32 = arith.constant 0 : i32
    %c0_i32_0 = arith.constant 0 : i32
    %c0_i32_1 = arith.constant 0 : i32
    return %c0_i32, %c0_i32_0 : i32, i32
  }
  func.func @transform_5(%arg0: i32) -> (i32, i32) {
    %c0_i32 = arith.constant 0 : i32
    %c0_i32_0 = arith.constant 0 : i32
    %c0_i32_1 = arith.constant 0 : i32
    return %c0_i32, %c0_i32_0 : i32, i32
  }
  func.func @transform_6(%arg0: i32) -> (i32, i32) {
    %c0_i32 = arith.constant 0 : i32
    %c0_i32_0 = arith.constant 0 : i32
    return %arg0, %c0_i32 : i32, i32
  }
}

</mosaic_0001>

<bundles_post_ra>
// kernel: _lambda_.1
= control target key start
LH: loop header
LB: loop body
LE: loop exit
PB: predicated region body
PF: predicated region fallthrough
CT: control target
= control target key end

     0   :  { %11 = vsyncpa [#allocation3], 0  ;;  %s4092_s0 = inlined_call_operand.hbm [shape: bf16[1024,128], index: 0, kind: input, shape index: {}]   ;;  %s4093_s1 = inlined_call_operand.hbm [shape: bf16[128,128], index: 1, kind: input, shape index: {}]   ;;  %s4094_s2 = inlined_call_operand.hbm [shape: bf16[128,128], index: 2, kind: input, shape index: {}]   ;;  %s4095_s3 = inlined_call_operand.vmem [shape: f32[1,128], index: 3, kind: input, shape index: {}, may-alias: {3,5}]   ;;  %s4096_s4 = inlined_call_operand.hbm [shape: bf16[128,128], index: 4, kind: input, shape index: {}]   ;;  %s4097_s5 = inlined_call_operand.vmem [shape: f32[1,128], index: 5, kind: input, shape index: {}, may-alias: {3,5}]   ;;  %s4098_s6 = inlined_call_operand.hbm [shape: bf16[1024,128], index: 6, kind: output, shape index: {}]  }
   0x1   :  { %13 = vsyncpa [#allocation3 + $0x1], 0 }
   0x2   :  { %14 = vsyncpa [#allocation6], 0 }
   0x3   :  { %15 = vsyncpa [#allocation9], 0 }
   0x4   :  { %16 = vsyncpa [#allocation4], 0 }
   0x5   :  { %18 = vsyncpa [#allocation4 + $0x1], 0  ;;  %s3484_s21 = smov 0   ;;  %s3486_s22 = smov 0  }
   0x6   :  { %s3488_s23 = smov 0   ;;  %s3490_s24 = smov 0  }
   0x7 LB: > { %s3505_s25 = sadd.s32 4294967295, %s3438_s24   ;;  %s2210_s26 = sadd.s32 4294967294, %s3438_s24   ;;  %s3438_s24 = sphi %s3490_s24, %s4121_s24   ;;  %s3434_s23 = sphi %s3488_s23, %s4120_s23   ;;  %s3430_s22 = sphi %s3486_s22, %s4119_s22   ;;  %s3426_s21 = sphi %s3484_s21, %s4118_s21  }
   0x8   : > { %p44_p0 = scmp.ne.s32.totalorder %s3430_s22, %s3426_s21  ;;  %p4099_p1 = scmp.eq.s32.totalorder %s3505_s25, 0 }
   0x9   : > { %p179_p3 = scmp.eq.s32.totalorder %s2210_s26, 1  ;;  %p2211_p5 = scmp.ge.s32.totalorder %s3438_s24, 1 }
   0xa   : > { %p3514_p4 = por %p4099_p1, %p44_p0  ;;  %p186_p7 = scmp.lt.s32.totalorder %s3438_s24, 3 }
   0xb   : > { %p3519_p6 = por %p179_p3, %p44_p0  ;;  %s3440_s30 = smov [#allocation5]  }
   0xc   : > { %s4102_s27 = scalar_select %p3514_p4, 1, 0 }
   0xd   : > { %s4103_s28 = scalar_select %p3519_p6, 1, 0 }
   0xe   : > { %p3524_p8 = pnand %p2211_p5, %p186_p7  ;;  %s198_s7 = sshll.u32 %s3440_s30, 4  ;;  %s3528_s7 = int_to_ptr.vmem [resolvable:$true] %s198_s7 }
   0xf   : > { %s3441_s9 = smov [#allocation7]   ;;  %s3442_s11 = smov [#allocation8]  }
  0x10   : > { %s4104_s29 = scalar_select %p3524_p8, 1, 0 }
  0x11   : > { %p3001_p9 = pneg %p3524_p8  ;;  %s211_s10 = sshll.u32 %s3441_s9, 4  ;;  %s3539_s10 = int_to_ptr.vmem [resolvable:$true] %s211_s10 }
  0x12   : > { %s3541_s12 = sshll.u32 %s3442_s11, 4  ;;  %s3250_s15 = scalar_lea.hbm %s4093_s1, 1024  ;;  %s228_s12 = int_to_ptr.vmem [resolvable:$true] %s3541_s12 }
  0x13   : > { %p3535_p11 = pnand %p3001_p9, %p4099_p1  ;;  %p3251_p12 = scmp.ne.s32.totalorder %s4093_s1, %s3250_s15 }
  0x14   : > { %p3257_p5 = scmp.lt.u32.totalorder %s3250_s15, %s4093_s1 }
  0x15   : > { %p3551_p13 = pneg %p3535_p11 }
  0x17   : > { %p3253_p0 = pnand %p3551_p13, %p3251_p12 }
  0x19   : > { %p3254_p3 = pneg %p3253_p0 }
  0x1b   : > { %p3259_p7 = pnand %p3257_p5, %p3254_p3 }
  0x1d   : > { %3262 = shalt.err (!%p3259_p7)
}
  0x1e   : > { %s3263_s26 = scalar_lea.vmem %s3528_s7, 1024  ;;  %p3271_p2 = scmp.lt.s32.totalorder %s3528_s7, %s3528_s7 }
  0x1f   : > { %p3264_p9 = scmp.ne.s32.totalorder %s3528_s7, %s3263_s26  ;;  %p3272_p6 = scmp.lt.s32.totalorder %s3263_s26, %s3263_s26 }
  0x21   : > { %p3266_p10 = pnand %p3264_p9, %p3551_p13  ;;  %p3273_p12 = por %p3272_p6, %p3271_p2 }
  0x23   : > { %p3267_p1 = pneg %p3266_p10 }
  0x25   : > { %p3274_p0 = pnand %p3273_p12, %p3267_p1 }
  0x27   : > { %3277 = shalt.err (!%p3274_p0)
}
  0x28   : > { %s3443_s30 = smov 64   ;;  %s3444_s9 = smov 4  }
  0x29   : > { %3004 = dma.hbm_to_vmem [thread:$0]  (!%p3535_p11), %s4093_s1, 1024, %s3528_s7, [#allocation6], %s3443_s30, %s3443_s30, %s3444_s9  }
  0x2a   : > { %s3278_s16 = scalar_lea.hbm %s4094_s2, 1024 }
  0x2b   : > { %p3279_p1 = scmp.ne.s32.totalorder %s4094_s2, %s3278_s16  ;;  %p3285_p10 = scmp.lt.u32.totalorder %s3278_s16, %s4094_s2 }
  0x2d   : > { %p3281_p2 = pnand %p3279_p1, %p3551_p13 }
  0x2f   : > { %p3282_p6 = pneg %p3281_p2 }
  0x31   : > { %p3287_p3 = pnand %p3285_p10, %p3282_p6 }
  0x33   : > { %3290 = shalt.err (!%p3287_p3)
}
  0x34   : > { %s3291_s7 = scalar_lea.vmem %s3539_s10, 1024  ;;  %p3299_p12 = scmp.lt.s32.totalorder %s3539_s10, %s3539_s10 }
  0x35   : > { %p3292_p5 = scmp.ne.s32.totalorder %s3539_s10, %s3291_s7  ;;  %p3300_p0 = scmp.lt.s32.totalorder %s3291_s7, %s3291_s7 }
  0x37   : > { %p3294_p7 = pnand %p3292_p5, %p3551_p13  ;;  %p3301_p1 = por %p3300_p0, %p3299_p12 }
  0x39   : > { %p3295_p9 = pneg %p3294_p7 }
  0x3b   : > { %p3302_p2 = pnand %p3301_p1, %p3295_p9 }
  0x3d   : > { %3305 = shalt.err (!%p3302_p2)
}
  0x3e   : > { %3007 = dma.hbm_to_vmem [thread:$0]  (!%p3535_p11), %s4094_s2, 1024, %s3539_s10, [#allocation6], %s3443_s30, %s3443_s30, %s3444_s9  }
  0x3f   : > { %s3306_s16 = scalar_lea.hbm %s4096_s4, 1024 }
  0x40   : > { %p3307_p6 = scmp.ne.s32.totalorder %s4096_s4, %s3306_s16  ;;  %p3313_p5 = scmp.lt.u32.totalorder %s3306_s16, %s4096_s4 }
  0x42   : > { %p3309_p10 = pnand %p3307_p6, %p3551_p13 }
  0x44   : > { %p3310_p3 = pneg %p3309_p10 }
  0x46   : > { %p3315_p7 = pnand %p3313_p5, %p3310_p3 }
  0x48   : > { %3318 = shalt.err (!%p3315_p7)
}
  0x49   : > { %s3319_s7 = scalar_lea.vmem %s228_s12, 1024  ;;  %p3327_p1 = scmp.lt.s32.totalorder %s228_s12, %s228_s12 }
  0x4a   : > { %p3320_p9 = scmp.ne.s32.totalorder %s228_s12, %s3319_s7  ;;  %p3328_p2 = scmp.lt.s32.totalorder %s3319_s7, %s3319_s7 }
  0x4c   : > { %p3322_p12 = pnand %p3320_p9, %p3551_p13  ;;  %p3329_p4 = por %p3328_p2, %p3327_p1 }
  0x4e   : > { %p3323_p0 = pneg %p3322_p12 }
  0x50   : > { %p3330_p8 = pnand %p3329_p4, %p3323_p0 }
  0x52   : > { %3333 = shalt.err (!%p3330_p8)
}
  0x53   : > { %3010 = dma.hbm_to_vmem [thread:$0]  (!%p3535_p11), %s4096_s4, 1024, %s228_s12, [#allocation9], %s3443_s30, %s3443_s30, %s3444_s9  }
  0x54   : > { %s3624_s18 = sadd.s32 1, %s3438_s24   ;;  %s31_s13 = sadd.s32 1, %s3434_s23 }
  0x55   : > { %s28_s8 = ssub.s32 %s3438_s24, %s3624_s18  ;;  %p38_p8 = scmp.ne.s32.totalorder %s3434_s23, %s3430_s22 }
  0x56   : > { %p29_p4 = scmp.eq.s32.totalorder %s28_s8, 0  ;;  %p39_p13 = scmp.eq.s32.totalorder %s3438_s24, 0 }
  0x57   : > { %p3022_p6 = scmp.lt.s32.totalorder %s3438_s24, 2  ;;  %p4107_p3 = scmp.eq.s32.totalorder %s3505_s25, 1 }
  0x58   : > { %s3634_s14 = scalar_select %p29_p4, %s3434_s23, %s31_s13  }
  0x59   : > { %p40_p10 = por %p39_p13, %p38_p8  ;;  %p3638_p5 = por %p4107_p3, %p38_p8 }
  0x5a   : > { %s244_s16 = sand.u32 1, %s3434_s23   ;;  %s2352_s17 = sshll.u32 %s3438_s24, 12 }
  0x5b   : > { %s2216_s12 = sshll.u32 %s244_s16, 8  ;;  %s3647_s26 = scalar_lea.hbm %s4092_s0, %s2352_s17 }
  0x5c   : > { %s248_s7 = scalar_lea.vmem [#allocation2], %s2216_s12  ;;  %p3649_p11 = pnand %p3022_p6, %p40_p10 }
  0x5d   : > { %s255_s10 = sshll.u32 %s248_s7, 4  ;;  %s3655_s8 = scalar_lea.sflag [#allocation3], %s244_s16  ;;  %s3653_s10 = int_to_ptr.vmem [resolvable:$true] %s255_s10 }
  0x5e   : > { %s3334_s13 = scalar_lea.hbm %s3647_s26, 4096  ;;  %p3336_p9 = pneg %p3649_p11 }
  0x5f   : > { %p3335_p7 = scmp.ne.s32.totalorder %s3647_s26, %s3334_s13  ;;  %s3339_s19 = scalar_lea.hbm %s4092_s0, 8192 }
  0x60   : > { %p3340_p1 = scmp.lt.u32.totalorder %s3647_s26, %s4092_s0  ;;  %p3341_p2 = scmp.lt.u32.totalorder %s3339_s19, %s3334_s13 }
  0x61   : > { %p3337_p12 = pnand %p3336_p9, %p3335_p7  ;;  %p3343_p8 = scmp.lt.u32.totalorder %s3334_s13, %s3647_s26 }
  0x62   : > { %p3342_p4 = por %p3341_p2, %p3340_p1 }
  0x63   : > { %p3338_p0 = pneg %p3337_p12 }
  0x64   : > { %p3344_p13 = por %p3343_p8, %p3342_p4 }
  0x66   : > { %p3345_p6 = pnand %p3344_p13, %p3338_p0 }
  0x68   : > { %3348 = shalt.err (!%p3345_p6)
}
  0x69   : > { %s3349_s16 = scalar_lea.vmem %s3653_s10, 4096  ;;  %s3445_s17 = smov [#allocation2]  }
  0x6a   : > { %p3350_p10 = scmp.ne.s32.totalorder %s3653_s10, %s3349_s16  ;;  %s3354_s12 = sshll.u32 %s3445_s17, 4  ;;  %s3355_s12 = int_to_ptr.vmem [resolvable:$false] %s3354_s12 }
  0x6b   : > { %s3356_s20 = scalar_lea.vmem %s3355_s12, 8192  ;;  %p3357_p12 = scmp.lt.s32.totalorder %s3653_s10, %s3355_s12 }
  0x6c   : > { %p3352_p3 = pnand %p3350_p10, %p3336_p9  ;;  %p3358_p1 = scmp.lt.s32.totalorder %s3356_s20, %s3349_s16 }
  0x6e   : > { %p3353_p7 = pneg %p3352_p3  ;;  %p3359_p2 = por %p3358_p1, %p3357_p12 }
  0x70   : > { %p3360_p4 = pnand %p3359_p2, %p3353_p7 }
  0x72   : > { %3363 = shalt.err (!%p3360_p4)
}
  0x73   : > { %3014 = dma.hbm_to_vmem [thread:$0]  (!%p3649_p11), %s3647_s26, 4096, %s3653_s10, %s3655_s8, %s3443_s30, %s3443_s30, %s3444_s9  }
  0x74   : > { %p4110_p9 = scmp.ne.s32.totalorder %s4104_s29, 0 }
  0x75   : > { %s3689_s13 = sand.u32 (!%p4110_p9), 1, %s3430_s22   ;;  %p4111_p0 = scmp.ne.s32.totalorder (!%p4110_p9), %s4102_s27, 0 }
  0x76   : > { %267 = sbr.rel (%p4110_p9) target bundleno = 983 (0x3d7), region = 44  ;;  %s2220_s19 = sshll.u32 (!%p4110_p9), %s3689_s13, 8 }
  0x77   : > { %s270_s7 = scalar_lea.sflag (!%p4110_p9), [#allocation3], %s3689_s13  ;;  %s3695_s11 = scalar_lea.vmem (!%p4110_p9), [#allocation2], %s2220_s19 }
  0x7d   : > { %3409 = dma.done.wait (%p4111_p0), %s270_s7, 4096  }
  0x7e   : > { %3411 = vsyncadd (%p4111_p0), %s270_s7, 4294963200  ;;  %p4112_p11 = scmp.eq.s32.totalorder %s3505_s25, 0 }
  0x80   : > { %3413 = dma.done.wait (%p4112_p11), [#allocation6], 2048   ;;  %p4113_p8 = pmov %p4112_p11 }
  0x82   : > { %3415 = vsyncadd (%p4113_p8), [#allocation6], 4294965248  ;;  %p4114_p13 = pmov %p4113_p8 }
  0x83   : > { %p4115_p6 = pmov %p4113_p8 }
  0x84   : > { %3417 = dma.done.wait (%p4114_p13), [#allocation9], 1024  }
  0x85   : > { %3419 = vsyncadd (%p4115_p6), [#allocation9], 4294966272  ;;  %v3066_v0 = vld [vmem:[#allocation5] sm:$0xff]   ;;  %v3067_v1 = vld [vmem:[#allocation5 + $0x8] sm:$0xff]   ;;  %s3947_s26 = scalar_lea.vmem [#allocation10], %s2220_s19  ;;  %s2417_s10 = sshll.u32 %s3505_s25, 12 }
  0x86   : > { %2729 = vmatprep.subr.bf16.mxu0 %v3066_v0  ;;  %2969 = vmatprep.subr.bf16.mxu1 %v3066_v0  ;;  %v3068_v2 = vld [vmem:[#allocation5 + $0x10] sm:$0xff]   ;;  %v3069_v3 = vld [vmem:[#allocation5 + $0x18] sm:$0xff]   ;;  %v3074_v4 = vld [vmem:[%s3695_s11] sm:$0xff]   ;;  %s2108_s8 = sshll.u32 %s3947_s26, 4  ;;  %s4044_s12 = scalar_lea.hbm %s4098_s6, %s2417_s10  ;;  %s4046_s8 = int_to_ptr.vmem [resolvable:$true] %s2108_s8 }
  0x87   : > { %2730 = vmatpush3.bf16.msra.mxu0 %v3066_v0  ;;  %2977 = vmatpush3.bf16.msra.mxu1 %v3066_v0  ;;  %v3070_v5 = vld [vmem:[#allocation5 + $0x20] sm:$0xff]   ;;  %v3071_v6 = vld [vmem:[#allocation5 + $0x28] sm:$0xff]   ;;  %v3072_v7 = vld [vmem:[#allocation5 + $0x30] sm:$0xff]   ;;  %s2095_s25 = scalar_lea.sflag [#allocation4], %s3689_s13  ;;  %s3364_s20 = scalar_lea.vmem %s4046_s8, 4096 }
  0x88   : > { %2731 = vmatprep.subr.bf16.mxu0 %v3067_v1  ;;  %2970 = vmatprep.subr.bf16.mxu1 %v3067_v1  ;;  %v3073_v8 = vld [vmem:[#allocation5 + $0x38] sm:$0xff]   ;;  %v3090_v9 = vld [vmem:[%s3695_s11 + $0x80] sm:$0xff]   ;;  %v3075_v10 = vld [vmem:[%s3695_s11 + $0x8] sm:$0xff]   ;;  %p3365_p10 = scmp.ne.s32.totalorder %s4046_s8, %s3364_s20  ;;  %s3446_s19 = smov [#allocation10]  }
  0x89   : > { %2745 = vmatprep.mubr.bf16.mxu0 %v3074_v4  ;;  %2777 = vmatprep.mubr.bf16.mxu1 %v3090_v9  ;;  %v3076_v11 = vld [vmem:[%s3695_s11 + $0x10] sm:$0xff]   ;;  %v3091_v12 = vld [vmem:[%s3695_s11 + $0x88] sm:$0xff]   ;;  %v3077_v14 = vld [vmem:[%s3695_s11 + $0x18] sm:$0xff]   ;;  %s3368_s7 = sshll.u32 %s3446_s19, 4  ;;  %s3369_s7 = int_to_ptr.vmem [resolvable:$false] %s3368_s7 }
  0x8a   : > { %v3092_v13 = vld [vmem:[%s3695_s11 + $0x90] sm:$0xff]   ;;  %v3078_v15 = vld [vmem:[%s3695_s11 + $0x20] sm:$0xff]   ;;  %v3093_v16 = vld [vmem:[%s3695_s11 + $0x98] sm:$0xff]   ;;  %p3366_p3 = pnand %p3365_p10, %p3638_p5  ;;  %p3371_p12 = scmp.lt.s32.totalorder %s4046_s8, %s3369_s7 }
  0x8b   : > { %2732 = vmatpush3.bf16.msra.mxu0 %v3067_v1  ;;  %2978 = vmatpush3.bf16.msra.mxu1 %v3067_v1  ;;  %v3094_v17 = vld [vmem:[%s3695_s11 + $0xa0] sm:$0xff]   ;;  %v3107_v19 = vld [vmem:[#allocation7 + $0x8] sm:$0xff]   ;;  %v3080_v22 = vld [vmem:[%s3695_s11 + $0x30] sm:$0xff]  }
  0x8c   : > { %2733 = vmatprep.subr.bf16.mxu0 %v3068_v2  ;;  %2971 = vmatprep.subr.bf16.mxu1 %v3068_v2  ;;  %v3106_v18 = vld [vmem:[#allocation7] sm:$0xff]   ;;  %v3079_v20 = vld [vmem:[%s3695_s11 + $0x28] sm:$0xff]   ;;  %v3096_v23 = vld [vmem:[%s3695_s11 + $0xb0] sm:$0xff]   ;;  %p3367_p7 = pneg %p3366_p3 }
  0x8d   : > { %v3095_v21 = vld [vmem:[%s3695_s11 + $0xa8] sm:$0xff]   ;;  %v3108_v24 = vld [vmem:[#allocation7 + $0x10] sm:$0xff]   ;;  %v3109_v25 = vld [vmem:[#allocation7 + $0x18] sm:$0xff]  }
  0x8e   : > { %v3081_v26 = vld [vmem:[%s3695_s11 + $0x38] sm:$0xff]   ;;  %v3082_v28 = vld [vmem:[%s3695_s11 + $0x40] sm:$0xff]   ;;  %v3111_v31 = vld [vmem:[#allocation7 + $0x28] sm:$0xff]  }
  0x8f   : > { %2734 = vmatpush3.bf16.msra.mxu0 %v3068_v2  ;;  %2979 = vmatpush3.bf16.msra.mxu1 %v3068_v2  ;;  %v3097_v27 = vld [vmem:[%s3695_s11 + $0xb8] sm:$0xff]   ;;  %v3098_v29 = vld [vmem:[%s3695_s11 + $0xc0] sm:$0xff]   ;;  %v3083_v32 = vld [vmem:[%s3695_s11 + $0x48] sm:$0xff]  }
  0x90   : > { %2735 = vmatprep.subr.bf16.mxu0 %v3069_v3  ;;  %2972 = vmatprep.subr.bf16.mxu1 %v3069_v3  ;;  %v3110_v30 = vld [vmem:[#allocation7 + $0x20] sm:$0xff]   ;;  %v3099_v33 = vld [vmem:[%s3695_s11 + $0xc8] sm:$0xff]   ;;  %v3084_v34 = vld [vmem:[%s3695_s11 + $0x50] sm:$0xff]  }
  0x91   : > { %v3100_v35 = vld [vmem:[%s3695_s11 + $0xd0] sm:$0xff]   ;;  %v3085_v36 = vld [vmem:[%s3695_s11 + $0x58] sm:$0xff]   ;;  %v3086_v38 = vld [vmem:[%s3695_s11 + $0x60] sm:$0xff]  }
  0x92   : > { %v3101_v37 = vld [vmem:[%s3695_s11 + $0xd8] sm:$0xff]   ;;  %v3102_v39 = vld [vmem:[%s3695_s11 + $0xe0] sm:$0xff]   ;;  %v3087_v40 = vld [vmem:[%s3695_s11 + $0x68] sm:$0xff]  }
  0x93   : > { %2736 = vmatpush3.bf16.msra.mxu0 %v3069_v3  ;;  %2980 = vmatpush3.bf16.msra.mxu1 %v3069_v3  ;;  %v3103_v41 = vld [vmem:[%s3695_s11 + $0xe8] sm:$0xff]   ;;  %v3088_v42 = vld [vmem:[%s3695_s11 + $0x70] sm:$0xff]   ;;  %v3089_v44 = vld [vmem:[%s3695_s11 + $0x78] sm:$0xff]  }
  0x94   : > { %2737 = vmatprep.subr.bf16.mxu0 %v3070_v5  ;;  %2973 = vmatprep.subr.bf16.mxu1 %v3070_v5  ;;  %v3104_v43 = vld [vmem:[%s3695_s11 + $0xf0] sm:$0xff]   ;;  %v3105_v45 = vld [vmem:[%s3695_s11 + $0xf8] sm:$0xff]   ;;  %s3370_s11 = scalar_lea.vmem %s3369_s7, 8192 }
  0x95   : > { %v3112_v46 = vld [vmem:[#allocation7 + $0x30] sm:$0xff]   ;;  %v3113_v47 = vld [vmem:[#allocation7 + $0x38] sm:$0xff]   ;;  %p3372_p1 = scmp.lt.s32.totalorder %s3370_s11, %s3364_s20 }
  0x97   : > { %2738 = vmatpush3.bf16.msra.mxu0 %v3070_v5  ;;  %2981 = vmatpush3.bf16.msra.mxu1 %v3070_v5  ;;  %p3373_p2 = por %p3372_p1, %p3371_p12 }
  0x98   : > { %2739 = vmatprep.subr.bf16.mxu0 %v3071_v6  ;;  %2974 = vmatprep.subr.bf16.mxu1 %v3071_v6 }
  0x99   : > { %p3374_p4 = pnand %p3373_p2, %p3367_p7 }
  0x9b   : > { %2740 = vmatpush3.bf16.msra.mxu0 %v3071_v6  ;;  %2982 = vmatpush3.bf16.msra.mxu1 %v3071_v6  ;;  %v3114_v6 = vld [vmem:[#allocation8] sm:$0xff]  }
  0x9c   : > { %2741 = vmatprep.subr.bf16.mxu0 %v3072_v7  ;;  %2975 = vmatprep.subr.bf16.mxu1 %v3072_v7 }
  0x9f   : > { %2742 = vmatpush3.bf16.msra.mxu0 %v3072_v7  ;;  %2983 = vmatpush3.bf16.msra.mxu1 %v3072_v7  ;;  %v3115_v7 = vld [vmem:[#allocation8 + $0x8] sm:$0xff]  }
  0xa0   : > { %2743 = vmatprep.subr.bf16.mxu0 %v3073_v8  ;;  %2976 = vmatprep.subr.bf16.mxu1 %v3073_v8 }
  0xa3   : > { %2744 = vmatpush3.bf16.msra.mxu0 %v3073_v8  ;;  %2984 = vmatpush3.bf16.msra.mxu1 %v3073_v8 }
  0xa4   : > { %2809 = vmatprep.subr.bf16.mxu1 %v3106_v18  ;;  %2889 = vmatprep.subr.bf16.mxu0 %v3114_v6 }
  0xa6   : > { %2746 = vmatmul.mubr.bf16.vlgmr.msra.gmra.mrb[0].mxu0 %v3075_v10  ;;  %2778 = vmatmul.mubr.bf16.vlgmr.msra.gmra.mrb[0].mxu1 %v3091_v12  ;;  %v3116_v10 = vld [vmem:[#allocation8 + $0x10] sm:$0xff]  }
  0xa7   : > { %2749 = vmatprep.mubr.bf16.mxu0 %v3076_v11  ;;  %2781 = vmatprep.mubr.bf16.mxu1 %v3092_v13 }
  0xa8   : > { %2810 = vmatpush3.bf16.msra.mxu1 %v3106_v18  ;;  %2890 = vmatpush3.bf16.msra.mxu0 %v3114_v6 }
  0xa9   : > { %2811 = vmatprep.subr.bf16.mxu1 %v3107_v19  ;;  %2891 = vmatprep.subr.bf16.mxu0 %v3115_v7 }
  0xac   : > { %2812 = vmatpush3.bf16.msra.mxu1 %v3107_v19  ;;  %2892 = vmatpush3.bf16.msra.mxu0 %v3115_v7 }
  0xad   : > { %2813 = vmatprep.subr.bf16.mxu1 %v3108_v24  ;;  %2893 = vmatprep.subr.bf16.mxu0 %v3116_v10 }
  0xae   : > { %2750 = vmatmul.mubr.bf16.gmra.mrb[4].mxu0 %v3077_v14  ;;  %2782 = vmatmul.mubr.bf16.gmra.mrb[4].mxu1 %v3093_v16 }
  0xaf   : > { %2753 = vmatprep.mubr.bf16.mxu0 %v3078_v15  ;;  %2785 = vmatprep.mubr.bf16.mxu1 %v3094_v17 }
  0xb0   : > { %2814 = vmatpush3.bf16.msra.mxu1 %v3108_v24  ;;  %2894 = vmatpush3.bf16.msra.mxu0 %v3116_v10 }
  0xb1   : > { %2815 = vmatprep.subr.bf16.mxu1 %v3109_v25 }
  0xb4   : > { %2816 = vmatpush3.bf16.msra.mxu1 %v3109_v25 }
  0xb5   : > { %2817 = vmatprep.subr.bf16.mxu1 %v3110_v30 }
  0xb6   : > { %2754 = vmatmul.mubr.bf16.gmra.mrb[8].mxu0 %v3079_v20  ;;  %2786 = vmatmul.mubr.bf16.gmra.mrb[8].mxu1 %v3095_v21 }
  0xb7   : > { %2757 = vmatprep.mubr.bf16.mxu0 %v3080_v22  ;;  %2789 = vmatprep.mubr.bf16.mxu1 %v3096_v23  ;;  %v3117_v23 = vld [vmem:[#allocation8 + $0x18] sm:$0xff]  }
  0xb8   : > { %2818 = vmatpush3.bf16.msra.mxu1 %v3110_v30  ;;  %2895 = vmatprep.subr.bf16.mxu0 %v3117_v23 }
  0xb9   : > { %2819 = vmatprep.subr.bf16.mxu1 %v3111_v31  ;;  %2896 = vmatpush3.bf16.msra.mxu0 %v3117_v23 }
  0xbc   : > { %2820 = vmatpush3.bf16.msra.mxu1 %v3111_v31 }
  0xbd   : > { %2821 = vmatprep.subr.bf16.mxu1 %v3112_v46 }
  0xbe   : > { %2758 = vmatmul.mubr.bf16.gmra.mrb[12].mxu0 %v3081_v26  ;;  %2790 = vmatmul.mubr.bf16.gmra.mrb[12].mxu1 %v3097_v27  ;;  %v3118_v26 = vld [vmem:[#allocation8 + $0x20] sm:$0xff]  }
  0xbf   : > { %2761 = vmatprep.mubr.bf16.mxu0 %v3082_v28  ;;  %2793 = vmatprep.mubr.bf16.mxu1 %v3098_v29 }
  0xc0   : > { %2822 = vmatpush3.bf16.msra.mxu1 %v3112_v46  ;;  %2897 = vmatprep.subr.bf16.mxu0 %v3118_v26 }
  0xc1   : > { %2823 = vmatprep.subr.bf16.mxu1 %v3113_v47  ;;  %2898 = vmatpush3.bf16.msra.mxu0 %v3118_v26 }
  0xc4   : > { %2824 = vmatpush3.bf16.msra.mxu1 %v3113_v47 }
  0xc6   : > { %2762 = vmatmul.mubr.bf16.gmra.mrb[16].mxu0 %v3083_v32  ;;  %2794 = vmatmul.mubr.bf16.gmra.mrb[16].mxu1 %v3099_v33 }
  0xc7   : > { %2765 = vmatprep.mubr.bf16.mxu0 %v3084_v34  ;;  %2797 = vmatprep.mubr.bf16.mxu1 %v3100_v35 }
  0xce   : > { %2766 = vmatmul.mubr.bf16.gmra.mrb[20].mxu0 %v3085_v36  ;;  %2798 = vmatmul.mubr.bf16.gmra.mrb[20].mxu1 %v3101_v37 }
  0xcf   : > { %2769 = vmatprep.mubr.bf16.mxu0 %v3086_v38  ;;  %2801 = vmatprep.mubr.bf16.mxu1 %v3102_v39  ;;  %v3119_v39 = vld [vmem:[#allocation8 + $0x28] sm:$0xff]  }
  0xd0   : > { %2899 = vmatprep.subr.bf16.mxu0 %v3119_v39 }
  0xd1   : > { %2900 = vmatpush3.bf16.msra.mxu0 %v3119_v39 }
  0xd6   : > { %2770 = vmatmul.mubr.bf16.gmra.mrb[24].mxu0 %v3087_v40  ;;  %2802 = vmatmul.mubr.bf16.gmra.mrb[24].mxu1 %v3103_v41 }
  0xd7   : > { %2773 = vmatprep.mubr.bf16.mxu0 %v3088_v42  ;;  %2805 = vmatprep.mubr.bf16.mxu1 %v3104_v43 }
  0xde   : > { %2774 = vmatmul.mubr.bf16.gmra.mrb[28].mxu0 %v3089_v44  ;;  %2806 = vmatmul.mubr.bf16.gmra.mrb[28].mxu1 %v3105_v45 }
 0x179   : > { %v2747_v48 = vpop.f32.mrb[0].mxu0  ;;  %v3741_v49 = vpop.f32.mrb[0].mxu1 }
 0x17a   : > { %v671_v50 = vpop.f32.mrb[1].mxu0  ;;  %v3743_v51 = vpop.f32.mrb[1].mxu1 }
 0x17b   : > { %v2748_v52 = vpop.f32.mrb[2].mxu0  ;;  %v3745_v53 = vpop.f32.mrb[2].mxu1 }
 0x17c   : > { %v927_v54 = vpack.c.bf16 %v2748_v52, %v2747_v48  ;;  %v674_v55 = vpop.f32.mrb[3].mxu0  ;;  %v943_v56 = vpack.c.bf16 %v3745_v53, %v3741_v49  ;;  %v3749_v57 = vpop.f32.mrb[3].mxu1 }
 0x17d   : > { %v926_v58 = vpack.c.bf16 %v674_v55, %v671_v50  ;;  %v942_v59 = vpack.c.bf16 %v3749_v57, %v3743_v51 }
 0x17f   : > { %3122 = vtanh.bf16 %v926_v58 }
 0x180   : > { %3124 = vtanh.bf16 %v927_v54 }
 0x181   : > { %v2751_v60 = vpop.f32.mrb[4].mxu0  ;;  %v3753_v61 = vpop.f32.mrb[4].mxu1 }
 0x182   : > { %v687_v62 = vpop.f32.mrb[5].mxu0  ;;  %v3755_v63 = vpop.f32.mrb[5].mxu1 }
 0x183   : > { %v2752_v0 = vpop.f32.mrb[6].mxu0  ;;  %v3757_v1 = vpop.f32.mrb[6].mxu1 }
 0x184   : > { %v929_v2 = vpack.c.bf16 %v2752_v0, %v2751_v60  ;;  %v690_v3 = vpop.f32.mrb[7].mxu0  ;;  %v945_v4 = vpack.c.bf16 %v3757_v1, %v3753_v61  ;;  %v3761_v5 = vpop.f32.mrb[7].mxu1  ;;  %v3120_v1 = vld [vmem:[#allocation8 + $0x30] sm:$0xff]  }
 0x185   : > { %v928_v8 = vpack.c.bf16 %v690_v3, %v687_v62  ;;  %v944_v9 = vpack.c.bf16 %v3761_v5, %v3755_v63  ;;  %2901 = vmatprep.subr.bf16.mxu0 %v3120_v1 }
 0x186   : > { %2902 = vmatpush3.bf16.msra.mxu0 %v3120_v1 }
 0x187   : > { %3126 = vtanh.bf16 %v928_v8 }
 0x188   : > { %3128 = vtanh.bf16 %v929_v2 }
 0x189   : > { %v2755_v11 = vpop.f32.mrb[8].mxu0  ;;  %v3765_v12 = vpop.f32.mrb[8].mxu1 }
 0x18a   : > { %v3123_v13 = vpop.eup %3122  ;;  %v703_v14 = vpop.f32.mrb[9].mxu0 }
 0x18b   : > { %v3767_v15 = vpop.f32.mrb[9].mxu1  ;;  %v3125_v16 = vpop.eup %3124  ;;  %2825 = vmatprep.mubr.bf16.mxu1 %v3123_v13 }
 0x18c   : > { %v2756_v17 = vpop.f32.mrb[10].mxu0  ;;  %v3769_v18 = vpop.f32.mrb[10].mxu1  ;;  %2826 = vmatmul.mubr.bf16.vlgmr.msra.gmra.mrb[32].mxu1 %v3125_v16 }
 0x18d   : > { %v931_v19 = vpack.c.bf16 %v2756_v17, %v2755_v11  ;;  %v706_v20 = vpop.f32.mrb[11].mxu0  ;;  %v947_v21 = vpack.c.bf16 %v3769_v18, %v3765_v12  ;;  %v3773_v22 = vpop.f32.mrb[11].mxu1 }
 0x18e   : > { %v930_v24 = vpack.c.bf16 %v706_v20, %v703_v14  ;;  %v946_v25 = vpack.c.bf16 %v3773_v22, %v3767_v15 }
 0x190   : > { %3130 = vtanh.bf16 %v930_v24 }
 0x191   : > { %3132 = vtanh.bf16 %v931_v19  ;;  %v2759_v27 = vpop.f32.mrb[12].mxu0  ;;  %v3777_v28 = vpop.f32.mrb[12].mxu1 }
 0x192   : > { %v3127_v29 = vpop.eup %3126  ;;  %v719_v30 = vpop.f32.mrb[13].mxu0 }
 0x193   : > { %v3779_v31 = vpop.f32.mrb[13].mxu1  ;;  %v3129_v32 = vpop.eup %3128  ;;  %2829 = vmatprep.mubr.bf16.mxu1 %v3127_v29 }
 0x194   : > { %v2760_v33 = vpop.f32.mrb[14].mxu0  ;;  %v3781_v34 = vpop.f32.mrb[14].mxu1  ;;  %2830 = vmatmul.mubr.bf16.gmra.mrb[36].mxu1 %v3129_v32 }
 0x195   : > { %v933_v35 = vpack.c.bf16 %v2760_v33, %v2759_v27  ;;  %v722_v36 = vpop.f32.mrb[15].mxu0  ;;  %v949_v37 = vpack.c.bf16 %v3781_v34, %v3777_v28  ;;  %v3785_v38 = vpop.f32.mrb[15].mxu1  ;;  %v3870_v28 = vld [vmem:[%s4095_s3] ss:$0 sm:$0xff] }
 0x196   : > { %v932_v40 = vpack.c.bf16 %v722_v36, %v719_v30  ;;  %v948_v41 = vpack.c.bf16 %v3785_v38, %v3779_v31 }
 0x198   : > { %3134 = vtanh.bf16 %v932_v40 }
 0x199   : > { %3136 = vtanh.bf16 %v933_v35  ;;  %v2763_v42 = vpop.f32.mrb[16].mxu0  ;;  %v3789_v43 = vpop.f32.mrb[16].mxu1 }
 0x19a   : > { %v735_v45 = vpop.f32.mrb[17].mxu0  ;;  %v3791_v46 = vpop.f32.mrb[17].mxu1 }
 0x19b   : > { %v3131_v44 = vpop.eup %3130  ;;  %v2764_v48 = vpop.f32.mrb[18].mxu0 }
 0x19c   : > { %v3133_v47 = vpop.eup %3132  ;;  %2833 = vmatprep.mubr.bf16.mxu1 %v3131_v44  ;;  %v3793_v50 = vpop.f32.mrb[18].mxu1  ;;  %v935_v52 = vpack.c.bf16 %v2764_v48, %v2763_v42 }
 0x19d   : > { %v738_v54 = vpop.f32.mrb[19].mxu0  ;;  %2834 = vmatmul.mubr.bf16.gmra.mrb[40].mxu1 %v3133_v47  ;;  %v951_v55 = vpack.c.bf16 %v3793_v50, %v3789_v43  ;;  %v3797_v58 = vpop.f32.mrb[19].mxu1 }
 0x19e   : > { %v934_v60 = vpack.c.bf16 %v738_v54, %v735_v45  ;;  %v950_v62 = vpack.c.bf16 %v3797_v58, %v3791_v46 }
 0x1a0   : > { %3138 = vtanh.bf16 %v934_v60 }
 0x1a1   : > { %3140 = vtanh.bf16 %v935_v52  ;;  %v2767_v0 = vpop.f32.mrb[20].mxu0  ;;  %v3801_v2 = vpop.f32.mrb[20].mxu1 }
 0x1a2   : > { %v751_v6 = vpop.f32.mrb[21].mxu0  ;;  %v3803_v7 = vpop.f32.mrb[21].mxu1 }
 0x1a3   : > { %v3135_v3 = vpop.eup %3134  ;;  %v2768_v10 = vpop.f32.mrb[22].mxu0 }
 0x1a4   : > { %v3137_v8 = vpop.eup %3136  ;;  %2837 = vmatprep.mubr.bf16.mxu1 %v3135_v3  ;;  %v3805_v11 = vpop.f32.mrb[22].mxu1  ;;  %v937_v13 = vpack.c.bf16 %v2768_v10, %v2767_v0 }
 0x1a5   : > { %v754_v14 = vpop.f32.mrb[23].mxu0  ;;  %2838 = vmatmul.mubr.bf16.gmra.mrb[44].mxu1 %v3137_v8  ;;  %v953_v16 = vpack.c.bf16 %v3805_v11, %v3801_v2  ;;  %v3809_v17 = vpop.f32.mrb[23].mxu1 }
 0x1a6   : > { %v936_v19 = vpack.c.bf16 %v754_v14, %v751_v6  ;;  %v952_v20 = vpack.c.bf16 %v3809_v17, %v3803_v7 }
 0x1a8   : > { %3142 = vtanh.bf16 %v936_v19 }
 0x1a9   : > { %3144 = vtanh.bf16 %v937_v13  ;;  %v2771_v23 = vpop.f32.mrb[24].mxu0  ;;  %v3813_v24 = vpop.f32.mrb[24].mxu1 }
 0x1aa   : > { %v767_v27 = vpop.f32.mrb[25].mxu0  ;;  %v3815_v29 = vpop.f32.mrb[25].mxu1 }
 0x1ab   : > { %v3139_v26 = vpop.eup %3138  ;;  %v2772_v32 = vpop.f32.mrb[26].mxu0 }
 0x1ac   : > { %v3141_v30 = vpop.eup %3140  ;;  %2841 = vmatprep.mubr.bf16.mxu1 %v3139_v26  ;;  %v3817_v33 = vpop.f32.mrb[26].mxu1  ;;  %v939_v35 = vpack.c.bf16 %v2772_v32, %v2771_v23 }
 0x1ad   : > { %v770_v36 = vpop.f32.mrb[27].mxu0  ;;  %2842 = vmatmul.mubr.bf16.gmra.mrb[48].mxu1 %v3141_v30  ;;  %v955_v39 = vpack.c.bf16 %v3817_v33, %v3813_v24  ;;  %v898_v40 = vpop.f32.mrb[27].mxu1 }
 0x1ae   : > { %v938_v42 = vpack.c.bf16 %v770_v36, %v767_v27  ;;  %v954_v44 = vpack.c.bf16 %v898_v40, %v3815_v29 }
 0x1b0   : > { %3146 = vtanh.bf16 %v938_v42 }
 0x1b1   : > { %3148 = vtanh.bf16 %v939_v35  ;;  %v2775_v45 = vpop.f32.mrb[28].mxu0  ;;  %v3822_v47 = vpop.f32.mrb[28].mxu1 }
 0x1b2   : > { %v783_v52 = vpop.f32.mrb[29].mxu0  ;;  %v911_v54 = vpop.f32.mrb[29].mxu1  ;;  %3150 = vtanh.bf16 %v942_v59 }
 0x1b3   : > { %v3143_v48 = vpop.eup %3142  ;;  %v2776_v0 = vpop.f32.mrb[30].mxu0 }
 0x1b4   : > { %v3145_v60 = vpop.eup %3144  ;;  %2845 = vmatprep.mubr.bf16.mxu1 %v3143_v48  ;;  %v3824_v3 = vpop.f32.mrb[30].mxu1  ;;  %v941_v6 = vpack.c.bf16 %v2776_v0, %v2775_v45 }
 0x1b5   : > { %v786_v8 = vpop.f32.mrb[31].mxu0  ;;  %2846 = vmatmul.mubr.bf16.gmra.mrb[52].mxu1 %v3145_v60  ;;  %v957_v10 = vpack.c.bf16 %v3824_v3, %v3822_v47  ;;  %v914_v13 = vpop.f32.mrb[31].mxu1 }
 0x1b6   : > { %v940_v14 = vpack.c.bf16 %v786_v8, %v783_v52  ;;  %v956_v19 = vpack.c.bf16 %v914_v13, %v911_v54 }
 0x1b8   : > { %3152 = vtanh.bf16 %v940_v14 }
 0x1b9   : > { %3154 = vtanh.bf16 %v941_v6 }
 0x1ba   : > { %3156 = vtanh.bf16 %v944_v9  ;;  %v3121_v9 = vld [vmem:[#allocation8 + $0x38] sm:$0xff]  }
 0x1bb   : > { %v3147_v23 = vpop.eup %3146  ;;  %3158 = vtanh.bf16 %v943_v56  ;;  %2903 = vmatprep.subr.bf16.mxu0 %v3121_v9 }
 0x1bc   : > { %v3149_v26 = vpop.eup %3148  ;;  %2849 = vmatprep.mubr.bf16.mxu1 %v3147_v23  ;;  %3160 = vtanh.bf16 %v946_v25  ;;  %2904 = vmatpush3.bf16.msra.mxu0 %v3121_v9 }
 0x1bd   : > { %2850 = vmatmul.mubr.bf16.gmra.mrb[56].mxu1 %v3149_v26  ;;  %v3151_v27 = vpop.eup %3150  ;;  %3162 = vtanh.bf16 %v945_v4 }
 0x1be   : > { %3164 = vtanh.bf16 %v948_v41 }
 0x1bf   : > { %3166 = vtanh.bf16 %v947_v21 }
 0x1c0   : > { %3168 = vtanh.bf16 %v950_v62 }
 0x1c1   : > { %3170 = vtanh.bf16 %v949_v37 }
 0x1c2   : > { %3172 = vtanh.bf16 %v952_v20 }
 0x1c3   : > { %v3153_v29 = vpop.eup %3152  ;;  %3174 = vtanh.bf16 %v951_v55 }
 0x1c4   : > { %v3155_v30 = vpop.eup %3154  ;;  %2853 = vmatprep.mubr.bf16.mxu1 %v3153_v29  ;;  %3176 = vtanh.bf16 %v954_v44 }
 0x1c5   : > { %2854 = vmatmul.mubr.bf16.gmra.mrb[60].mxu1 %v3155_v30  ;;  %v3157_v51 = vpop.eup %3156  ;;  %3178 = vtanh.bf16 %v953_v16 }
 0x1c6   : > { %2857 = vmatprep.mubr.bf16.mxu1 %v3151_v27  ;;  %v3159_v57 = vpop.eup %3158  ;;  %3180 = vtanh.bf16 %v956_v19 }
 0x1c7   : > { %v3161_v49 = vpop.eup %3160  ;;  %3182 = vtanh.bf16 %v955_v39 }
 0x1c8   : > { %v3163_v53 = vpop.eup %3162  ;;  %3184 = vtanh.bf16 %v957_v10 }
 0x1c9   : > { %v3165_v56 = vpop.eup %3164 }
 0x1ca   : > { %v3167_v59 = vpop.eup %3166 }
 0x1cb   : > { %v3169_v61 = vpop.eup %3168 }
 0x1cc   : > { %v3171_v63 = vpop.eup %3170 }
 0x1cd   : > { %2858 = vmatmul.mubr.bf16.gmra.mrb[64].mxu1 %v3159_v57  ;;  %v3173_v4 = vpop.eup %3172 }
 0x1ce   : > { %2861 = vmatprep.mubr.bf16.mxu1 %v3157_v51  ;;  %v3175_v5 = vpop.eup %3174 }
 0x1cf   : > { %v3177_v12 = vpop.eup %3176 }
 0x1d0   : > { %v3179_v15 = vpop.eup %3178 }
 0x1d1   : > { %v3181_v18 = vpop.eup %3180 }
 0x1d2   : > { %v3183_v21 = vpop.eup %3182 }
 0x1d3   : > { %v3185_v22 = vpop.eup %3184 }
 0x1d5   : > { %2862 = vmatmul.mubr.bf16.gmra.mrb[68].mxu1 %v3163_v53 }
 0x1d6   : > { %2865 = vmatprep.mubr.bf16.mxu1 %v3161_v49 }
 0x1dd   : > { %2866 = vmatmul.mubr.bf16.gmra.mrb[72].mxu1 %v3167_v59 }
 0x1de   : > { %2869 = vmatprep.mubr.bf16.mxu1 %v3165_v56 }
 0x1e5   : > { %2870 = vmatmul.mubr.bf16.gmra.mrb[76].mxu1 %v3171_v63 }
 0x1e6   : > { %2873 = vmatprep.mubr.bf16.mxu1 %v3169_v61 }
 0x1ed   : > { %2874 = vmatmul.mubr.bf16.gmra.mrb[80].mxu1 %v3175_v5 }
 0x1ee   : > { %2877 = vmatprep.mubr.bf16.mxu1 %v3173_v4 }
 0x1f5   : > { %2878 = vmatmul.mubr.bf16.gmra.mrb[84].mxu1 %v3179_v15 }
 0x1f6   : > { %2881 = vmatprep.mubr.bf16.mxu1 %v3177_v12 }
 0x1fd   : > { %2882 = vmatmul.mubr.bf16.gmra.mrb[88].mxu1 %v3183_v21 }
 0x1fe   : > { %2885 = vmatprep.mubr.bf16.mxu1 %v3181_v18 }
 0x205   : > { %2886 = vmatmul.mubr.bf16.gmra.mrb[92].mxu1 %v3185_v22 }
 0x25f   : > { %v2827_v25 = vpop.f32.mrb[32].mxu1 }
 0x260   : > { %v1095_v31 = vpop.f32.mrb[33].mxu1  ;;  %v1104_v37 = vadd.f32 %v2827_v25, %v3870_v28 }
 0x261   : > { %v2828_v34 = vpop.f32.mrb[34].mxu1  ;;  %v1096_v43 = vadd.f32 %v3870_v28, %v1095_v31 }
 0x262   : > { %v1107_v38 = vadd.f32 %v2828_v34, %v3870_v28  ;;  %v1098_v41 = vpop.f32.mrb[35].mxu1 }
 0x263   : > { %v1099_v46 = vadd.f32 %v3870_v28, %v1098_v41 }
 0x264   : > { %v1351_v50 = vpack.c.bf16 %v1107_v38, %v1104_v37 }
 0x265   : > { %v1350_v55 = vpack.c.bf16 %v1099_v46, %v1096_v43 }
 0x267   : > { %3186 = vtanh.bf16 %v1350_v55  ;;  %v2831_v58 = vpop.f32.mrb[36].mxu1 }
 0x268   : > { %3188 = vtanh.bf16 %v1351_v50  ;;  %v1111_v62 = vpop.f32.mrb[37].mxu1  ;;  %v1120_v7 = vadd.f32 %v2831_v58, %v3870_v28 }
 0x269   : > { %v2832_v2 = vpop.f32.mrb[38].mxu1  ;;  %v1112_v17 = vadd.f32 %v3870_v28, %v1111_v62 }
 0x26a   : > { %v1123_v11 = vadd.f32 %v2832_v2, %v3870_v28  ;;  %v1114_v16 = vpop.f32.mrb[39].mxu1 }
 0x26b   : > { %v1115_v20 = vadd.f32 %v3870_v28, %v1114_v16 }
 0x26c   : > { %v1353_v24 = vpack.c.bf16 %v1123_v11, %v1120_v7 }
 0x26d   : > { %v1352_v32 = vpack.c.bf16 %v1115_v20, %v1112_v17 }
 0x26f   : > { %3190 = vtanh.bf16 %v1352_v32 }
 0x270   : > { %v2835_v33 = vpop.f32.mrb[40].mxu1  ;;  %3192 = vtanh.bf16 %v1353_v24 }
 0x271   : > { %v1127_v35 = vpop.f32.mrb[41].mxu1  ;;  %v1136_v40 = vadd.f32 %v2835_v33, %v3870_v28 }
 0x272   : > { %v2836_v36 = vpop.f32.mrb[42].mxu1  ;;  %v3187_v39 = vpop.eup %3186  ;;  %v1128_v47 = vadd.f32 %v3870_v28, %v1127_v35 }
 0x273   : > { %v1139_v42 = vadd.f32 %v2836_v36, %v3870_v28  ;;  %v1130_v44 = vpop.f32.mrb[43].mxu1  ;;  %v3189_v45 = vpop.eup %3188  ;;  %2905 = vmatprep.mubr.bf16.mxu0 %v3187_v39 }
 0x274   : > { %v1131_v48 = vadd.f32 %v3870_v28, %v1130_v44  ;;  %2906 = vmatmul.mubr.bf16.vlgmr.msra.gmra.mrb[32].mxu0 %v3189_v45 }
 0x275   : > { %v1355_v52 = vpack.c.bf16 %v1139_v42, %v1136_v40 }
 0x276   : > { %v1354_v54 = vpack.c.bf16 %v1131_v48, %v1128_v47 }
 0x278   : > { %3194 = vtanh.bf16 %v1354_v54  ;;  %v2839_v60 = vpop.f32.mrb[44].mxu1 }
 0x279   : > { %3196 = vtanh.bf16 %v1355_v52  ;;  %v1143_v0 = vpop.f32.mrb[45].mxu1  ;;  %v1152_v8 = vadd.f32 %v2839_v60, %v3870_v28 }
 0x27a   : > { %v2840_v3 = vpop.f32.mrb[46].mxu1  ;;  %v3191_v6 = vpop.eup %3190  ;;  %v1144_v19 = vadd.f32 %v3870_v28, %v1143_v0 }
 0x27b   : > { %v1155_v10 = vadd.f32 %v2840_v3, %v3870_v28  ;;  %v1146_v13 = vpop.f32.mrb[47].mxu1  ;;  %v3193_v14 = vpop.eup %3192  ;;  %2909 = vmatprep.mubr.bf16.mxu0 %v3191_v6 }
 0x27c   : > { %v1147_v23 = vadd.f32 %v3870_v28, %v1146_v13  ;;  %2910 = vmatmul.mubr.bf16.gmra.mrb[36].mxu0 %v3193_v14 }
 0x27d   : > { %v1357_v26 = vpack.c.bf16 %v1155_v10, %v1152_v8 }
 0x27e   : > { %v1356_v27 = vpack.c.bf16 %v1147_v23, %v1144_v19 }
 0x280   : > { %3198 = vtanh.bf16 %v1356_v27  ;;  %v2843_v29 = vpop.f32.mrb[48].mxu1 }
 0x281   : > { %3200 = vtanh.bf16 %v1357_v26  ;;  %v1159_v30 = vpop.f32.mrb[49].mxu1  ;;  %v1168_v49 = vadd.f32 %v2843_v29, %v3870_v28 }
 0x282   : > { %v2844_v51 = vpop.f32.mrb[50].mxu1  ;;  %v1160_v61 = vadd.f32 %v3870_v28, %v1159_v30 }
 0x283   : > { %v3195_v57 = vpop.eup %3194  ;;  %v1171_v53 = vadd.f32 %v2844_v51, %v3870_v28  ;;  %v1162_v56 = vpop.f32.mrb[51].mxu1 }
 0x284   : > { %v3197_v59 = vpop.eup %3196  ;;  %v1163_v63 = vadd.f32 %v3870_v28, %v1162_v56  ;;  %2913 = vmatprep.mubr.bf16.mxu0 %v3195_v57 }
 0x285   : > { %v1359_v1 = vpack.c.bf16 %v1171_v53, %v1168_v49  ;;  %2914 = vmatmul.mubr.bf16.gmra.mrb[40].mxu0 %v3197_v59 }
 0x286   : > { %v1358_v4 = vpack.c.bf16 %v1163_v63, %v1160_v61 }
 0x288   : > { %3202 = vtanh.bf16 %v1358_v4  ;;  %v2847_v5 = vpop.f32.mrb[52].mxu1 }
 0x289   : > { %3204 = vtanh.bf16 %v1359_v1  ;;  %v1175_v9 = vpop.f32.mrb[53].mxu1  ;;  %v1184_v18 = vadd.f32 %v2847_v5, %v3870_v28 }
 0x28a   : > { %v2848_v12 = vpop.f32.mrb[54].mxu1  ;;  %v1176_v31 = vadd.f32 %v3870_v28, %v1175_v9 }
 0x28b   : > { %v3199_v15 = vpop.eup %3198  ;;  %v1187_v21 = vadd.f32 %v2848_v12, %v3870_v28  ;;  %v1178_v22 = vpop.f32.mrb[55].mxu1 }
 0x28c   : > { %v3201_v25 = vpop.eup %3200  ;;  %v1179_v34 = vadd.f32 %v3870_v28, %v1178_v22  ;;  %2917 = vmatprep.mubr.bf16.mxu0 %v3199_v15 }
 0x28d   : > { %v1361_v37 = vpack.c.bf16 %v1187_v21, %v1184_v18  ;;  %2918 = vmatmul.mubr.bf16.gmra.mrb[44].mxu0 %v3201_v25 }
 0x28e   : > { %v1360_v38 = vpack.c.bf16 %v1179_v34, %v1176_v31 }
 0x290   : > { %3206 = vtanh.bf16 %v1360_v38  ;;  %v2851_v41 = vpop.f32.mrb[56].mxu1 }
 0x291   : > { %3208 = vtanh.bf16 %v1361_v37  ;;  %v1191_v43 = vpop.f32.mrb[57].mxu1  ;;  %v1200_v55 = vadd.f32 %v2851_v41, %v3870_v28 }
 0x292   : > { %v2852_v46 = vpop.f32.mrb[58].mxu1  ;;  %v1192_v7 = vadd.f32 %v3870_v28, %v1191_v43 }
 0x293   : > { %v3203_v50 = vpop.eup %3202  ;;  %v1203_v58 = vadd.f32 %v2852_v46, %v3870_v28  ;;  %v1194_v62 = vpop.f32.mrb[59].mxu1 }
 0x294   : > { %v3205_v2 = vpop.eup %3204  ;;  %v1195_v11 = vadd.f32 %v3870_v28, %v1194_v62  ;;  %2921 = vmatprep.mubr.bf16.mxu0 %v3203_v50 }
 0x295   : > { %v1363_v16 = vpack.c.bf16 %v1203_v58, %v1200_v55  ;;  %2922 = vmatmul.mubr.bf16.gmra.mrb[48].mxu0 %v3205_v2 }
 0x296   : > { %v1362_v17 = vpack.c.bf16 %v1195_v11, %v1192_v7 }
 0x298   : > { %3210 = vtanh.bf16 %v1362_v17  ;;  %v2855_v20 = vpop.f32.mrb[60].mxu1 }
 0x299   : > { %3212 = vtanh.bf16 %v1363_v16  ;;  %v1207_v24 = vpop.f32.mrb[61].mxu1  ;;  %v1216_v35 = vadd.f32 %v2855_v20, %v3870_v28 }
 0x29a   : > { %v2856_v32 = vpop.f32.mrb[62].mxu1  ;;  %v1208_v42 = vadd.f32 %v3870_v28, %v1207_v24 }
 0x29b   : > { %v3207_v33 = vpop.eup %3206  ;;  %v1219_v36 = vadd.f32 %v2856_v32, %v3870_v28  ;;  %v1210_v39 = vpop.f32.mrb[63].mxu1 }
 0x29c   : > { %v3209_v40 = vpop.eup %3208  ;;  %v1211_v44 = vadd.f32 %v3870_v28, %v1210_v39  ;;  %2925 = vmatprep.mubr.bf16.mxu0 %v3207_v33 }
 0x29d   : > { %v1365_v45 = vpack.c.bf16 %v1219_v36, %v1216_v35  ;;  %2926 = vmatmul.mubr.bf16.gmra.mrb[52].mxu0 %v3209_v40 }
 0x29e   : > { %v1364_v47 = vpack.c.bf16 %v1211_v44, %v1208_v42 }
 0x2a0   : > { %3214 = vtanh.bf16 %v1364_v47  ;;  %v2859_v48 = vpop.f32.mrb[64].mxu1 }
 0x2a1   : > { %3216 = vtanh.bf16 %v1365_v45  ;;  %v1223_v52 = vpop.f32.mrb[65].mxu1  ;;  %v1232_v0 = vadd.f32 %v2859_v48, %v3870_v28 }
 0x2a2   : > { %v2860_v54 = vpop.f32.mrb[66].mxu1  ;;  %v1224_v10 = vadd.f32 %v3870_v28, %v1223_v52 }
 0x2a3   : > { %v3211_v60 = vpop.eup %3210  ;;  %v1235_v3 = vadd.f32 %v2860_v54, %v3870_v28  ;;  %v1226_v6 = vpop.f32.mrb[67].mxu1 }
 0x2a4   : > { %v3213_v8 = vpop.eup %3212  ;;  %v1227_v13 = vadd.f32 %v3870_v28, %v1226_v6  ;;  %2929 = vmatprep.mubr.bf16.mxu0 %v3211_v60 }
 0x2a5   : > { %v1367_v14 = vpack.c.bf16 %v1235_v3, %v1232_v0  ;;  %2930 = vmatmul.mubr.bf16.gmra.mrb[56].mxu0 %v3213_v8 }
 0x2a6   : > { %v1366_v19 = vpack.c.bf16 %v1227_v13, %v1224_v10 }
 0x2a8   : > { %3218 = vtanh.bf16 %v1366_v19  ;;  %v2863_v23 = vpop.f32.mrb[68].mxu1 }
 0x2a9   : > { %3220 = vtanh.bf16 %v1367_v14  ;;  %v1239_v26 = vpop.f32.mrb[69].mxu1  ;;  %v1248_v30 = vadd.f32 %v2863_v23, %v3870_v28 }
 0x2aa   : > { %v2864_v27 = vpop.f32.mrb[70].mxu1  ;;  %v1240_v53 = vadd.f32 %v3870_v28, %v1239_v26 }
 0x2ab   : > { %v3215_v29 = vpop.eup %3214  ;;  %v1251_v51 = vadd.f32 %v2864_v27, %v3870_v28  ;;  %v1242_v57 = vpop.f32.mrb[71].mxu1 }
 0x2ac   : > { %v3217_v49 = vpop.eup %3216  ;;  %v1243_v56 = vadd.f32 %v3870_v28, %v1242_v57  ;;  %2933 = vmatprep.mubr.bf16.mxu0 %v3215_v29 }
 0x2ad   : > { %v1369_v59 = vpack.c.bf16 %v1251_v51, %v1248_v30  ;;  %2934 = vmatmul.mubr.bf16.gmra.mrb[60].mxu0 %v3217_v49 }
 0x2ae   : > { %v1368_v61 = vpack.c.bf16 %v1243_v56, %v1240_v53 }
 0x2b0   : > { %3222 = vtanh.bf16 %v1368_v61  ;;  %v2867_v63 = vpop.f32.mrb[72].mxu1 }
 0x2b1   : > { %3224 = vtanh.bf16 %v1369_v59  ;;  %v1255_v1 = vpop.f32.mrb[73].mxu1  ;;  %v1264_v9 = vadd.f32 %v2867_v63, %v3870_v28 }
 0x2b2   : > { %v2868_v4 = vpop.f32.mrb[74].mxu1  ;;  %v1256_v21 = vadd.f32 %v3870_v28, %v1255_v1 }
 0x2b3   : > { %v3219_v5 = vpop.eup %3218  ;;  %v1267_v12 = vadd.f32 %v2868_v4, %v3870_v28  ;;  %v1258_v15 = vpop.f32.mrb[75].mxu1 }
 0x2b4   : > { %v3221_v18 = vpop.eup %3220  ;;  %v1259_v22 = vadd.f32 %v3870_v28, %v1258_v15  ;;  %2937 = vmatprep.mubr.bf16.mxu0 %v3219_v5 }
 0x2b5   : > { %v1371_v25 = vpack.c.bf16 %v1267_v12, %v1264_v9  ;;  %2938 = vmatmul.mubr.bf16.gmra.mrb[64].mxu0 %v3221_v18 }
 0x2b6   : > { %v1370_v31 = vpack.c.bf16 %v1259_v22, %v1256_v21 }
 0x2b8   : > { %3226 = vtanh.bf16 %v1370_v31  ;;  %v2871_v34 = vpop.f32.mrb[76].mxu1 }
 0x2b9   : > { %3228 = vtanh.bf16 %v1371_v25  ;;  %v1271_v37 = vpop.f32.mrb[77].mxu1  ;;  %v1280_v43 = vadd.f32 %v2871_v34, %v3870_v28 }
 0x2ba   : > { %v2872_v38 = vpop.f32.mrb[78].mxu1  ;;  %v1272_v58 = vadd.f32 %v3870_v28, %v1271_v37 }
 0x2bb   : > { %v3223_v41 = vpop.eup %3222  ;;  %v1283_v46 = vadd.f32 %v2872_v38, %v3870_v28  ;;  %v1274_v50 = vpop.f32.mrb[79].mxu1 }
 0x2bc   : > { %v3225_v55 = vpop.eup %3224  ;;  %v1275_v62 = vadd.f32 %v3870_v28, %v1274_v50  ;;  %2941 = vmatprep.mubr.bf16.mxu0 %v3223_v41 }
 0x2bd   : > { %v1373_v2 = vpack.c.bf16 %v1283_v46, %v1280_v43  ;;  %2942 = vmatmul.mubr.bf16.gmra.mrb[68].mxu0 %v3225_v55 }
 0x2be   : > { %v1372_v7 = vpack.c.bf16 %v1275_v62, %v1272_v58 }
 0x2c0   : > { %3230 = vtanh.bf16 %v1372_v7  ;;  %v2875_v11 = vpop.f32.mrb[80].mxu1 }
 0x2c1   : > { %3232 = vtanh.bf16 %v1373_v2  ;;  %v1287_v16 = vpop.f32.mrb[81].mxu1  ;;  %v1296_v24 = vadd.f32 %v2875_v11, %v3870_v28 }
 0x2c2   : > { %v2876_v17 = vpop.f32.mrb[82].mxu1  ;;  %v1288_v36 = vadd.f32 %v3870_v28, %v1287_v16 }
 0x2c3   : > { %v3227_v20 = vpop.eup %3226  ;;  %v1299_v32 = vadd.f32 %v2876_v17, %v3870_v28  ;;  %v1290_v33 = vpop.f32.mrb[83].mxu1 }
 0x2c4   : > { %v3229_v35 = vpop.eup %3228  ;;  %v1291_v39 = vadd.f32 %v3870_v28, %v1290_v33  ;;  %2945 = vmatprep.mubr.bf16.mxu0 %v3227_v20 }
 0x2c5   : > { %v1375_v40 = vpack.c.bf16 %v1299_v32, %v1296_v24  ;;  %2946 = vmatmul.mubr.bf16.gmra.mrb[72].mxu0 %v3229_v35 }
 0x2c6   : > { %v1374_v42 = vpack.c.bf16 %v1291_v39, %v1288_v36 }
 0x2c8   : > { %3234 = vtanh.bf16 %v1374_v42  ;;  %v2879_v44 = vpop.f32.mrb[84].mxu1 }
 0x2c9   : > { %3236 = vtanh.bf16 %v1375_v40  ;;  %v1303_v45 = vpop.f32.mrb[85].mxu1  ;;  %v1312_v52 = vadd.f32 %v2879_v44, %v3870_v28 }
 0x2ca   : > { %v2880_v47 = vpop.f32.mrb[86].mxu1  ;;  %v1304_v3 = vadd.f32 %v3870_v28, %v1303_v45 }
 0x2cb   : > { %v3231_v48 = vpop.eup %3230  ;;  %v1315_v54 = vadd.f32 %v2880_v47, %v3870_v28  ;;  %v1306_v60 = vpop.f32.mrb[87].mxu1 }
 0x2cc   : > { %v3233_v0 = vpop.eup %3232  ;;  %v1307_v6 = vadd.f32 %v3870_v28, %v1306_v60  ;;  %2949 = vmatprep.mubr.bf16.mxu0 %v3231_v48 }
 0x2cd   : > { %v1377_v8 = vpack.c.bf16 %v1315_v54, %v1312_v52  ;;  %2950 = vmatmul.mubr.bf16.gmra.mrb[76].mxu0 %v3233_v0 }
 0x2ce   : > { %v1376_v10 = vpack.c.bf16 %v1307_v6, %v1304_v3 }
 0x2d0   : > { %3238 = vtanh.bf16 %v1376_v10  ;;  %v2883_v13 = vpop.f32.mrb[88].mxu1 }
 0x2d1   : > { %3240 = vtanh.bf16 %v1377_v8  ;;  %v1319_v14 = vpop.f32.mrb[89].mxu1  ;;  %v1328_v26 = vadd.f32 %v2883_v13, %v3870_v28 }
 0x2d2   : > { %v2884_v19 = vpop.f32.mrb[90].mxu1  ;;  %v1320_v51 = vadd.f32 %v3870_v28, %v1319_v14 }
 0x2d3   : > { %v3235_v23 = vpop.eup %3234  ;;  %v1331_v27 = vadd.f32 %v2884_v19, %v3870_v28  ;;  %v1322_v29 = vpop.f32.mrb[91].mxu1 }
 0x2d4   : > { %v3237_v30 = vpop.eup %3236  ;;  %v1323_v57 = vadd.f32 %v3870_v28, %v1322_v29  ;;  %2953 = vmatprep.mubr.bf16.mxu0 %v3235_v23 }
 0x2d5   : > { %v1379_v49 = vpack.c.bf16 %v1331_v27, %v1328_v26  ;;  %2954 = vmatmul.mubr.bf16.gmra.mrb[80].mxu0 %v3237_v30 }
 0x2d6   : > { %v1378_v53 = vpack.c.bf16 %v1323_v57, %v1320_v51 }
 0x2d8   : > { %3242 = vtanh.bf16 %v1378_v53  ;;  %v2887_v56 = vpop.f32.mrb[92].mxu1 }
 0x2d9   : > { %3244 = vtanh.bf16 %v1379_v49  ;;  %v1335_v59 = vpop.f32.mrb[93].mxu1  ;;  %v1344_v1 = vadd.f32 %v2887_v56, %v3870_v28 }
 0x2da   : > { %v2888_v61 = vpop.f32.mrb[94].mxu1  ;;  %v1336_v12 = vadd.f32 %v3870_v28, %v1335_v59 }
 0x2db   : > { %v3239_v63 = vpop.eup %3238  ;;  %v1347_v4 = vadd.f32 %v2888_v61, %v3870_v28  ;;  %v1338_v5 = vpop.f32.mrb[95].mxu1 }
 0x2dc   : > { %v3241_v9 = vpop.eup %3240  ;;  %v1339_v15 = vadd.f32 %v3870_v28, %v1338_v5  ;;  %2957 = vmatprep.mubr.bf16.mxu0 %v3239_v63  ;;  %v3939_v28 = vld [vmem:[%s4097_s5] ss:$0 sm:$0xff] }
 0x2dd   : > { %v1381_v18 = vpack.c.bf16 %v1347_v4, %v1344_v1  ;;  %2958 = vmatmul.mubr.bf16.gmra.mrb[84].mxu0 %v3241_v9 }
 0x2de   : > { %v1380_v21 = vpack.c.bf16 %v1339_v15, %v1336_v12 }
 0x2e0   : > { %3246 = vtanh.bf16 %v1380_v21 }
 0x2e1   : > { %3248 = vtanh.bf16 %v1381_v18 }
 0x2e3   : > { %v3243_v22 = vpop.eup %3242 }
 0x2e4   : > { %v3245_v25 = vpop.eup %3244  ;;  %2961 = vmatprep.mubr.bf16.mxu0 %v3243_v22 }
 0x2e5   : > { %2962 = vmatmul.mubr.bf16.gmra.mrb[88].mxu0 %v3245_v25 }
 0x2eb   : > { %v3247_v31 = vpop.eup %3246 }
 0x2ec   : > { %v3249_v34 = vpop.eup %3248  ;;  %2965 = vmatprep.mubr.bf16.mxu0 %v3247_v31 }
 0x2ed   : > { %2966 = vmatmul.mubr.bf16.gmra.mrb[92].mxu0 %v3249_v34 }
 0x347   : > { %v2907_v37 = vpop.f32.mrb[32].mxu0 }
 0x348   : > { %v1519_v38 = vpop.f32.mrb[33].mxu0  ;;  %v1528_v43 = vadd.f32 %v2907_v37, %v3939_v28 }
 0x349   : > { %v2908_v41 = vpop.f32.mrb[34].mxu0  ;;  %v1520_v55 = vadd.f32 %v3939_v28, %v1519_v38 }
 0x34a   : > { %v1531_v46 = vadd.f32 %v2908_v41, %v3939_v28  ;;  %v1522_v50 = vpop.f32.mrb[35].mxu0 }
 0x34b   : > { %v1523_v58 = vadd.f32 %v3939_v28, %v1522_v50 }
 0x34c   : > { %v2426_v62 = vpack.c.bf16 %v1531_v46, %v1528_v43 }
 0x34d   : > { %v2421_v2 = vpack.c.bf16 %v1523_v58, %v1520_v55 }
 0x34e   : > { %2578 = vst [vmem:[%s3947_s26 + $0x8] sm:$0xff] %v2426_v62  }
 0x34f   : > { %2422 = vst [vmem:[%s3947_s26] sm:$0xff] %v2421_v2   ;;  %v2911_v7 = vpop.f32.mrb[36].mxu0 }
 0x350   : > { %v1535_v11 = vpop.f32.mrb[37].mxu0  ;;  %v1544_v17 = vadd.f32 %v2911_v7, %v3939_v28 }
 0x351   : > { %v2912_v16 = vpop.f32.mrb[38].mxu0  ;;  %v1536_v32 = vadd.f32 %v3939_v28, %v1535_v11 }
 0x352   : > { %v1547_v20 = vadd.f32 %v2912_v16, %v3939_v28  ;;  %v1538_v24 = vpop.f32.mrb[39].mxu0 }
 0x353   : > { %v1539_v33 = vadd.f32 %v3939_v28, %v1538_v24 }
 0x354   : > { %v2436_v35 = vpack.c.bf16 %v1547_v20, %v1544_v17 }
 0x355   : > { %v2431_v36 = vpack.c.bf16 %v1539_v33, %v1536_v32 }
 0x356   : > { %2580 = vst [vmem:[%s3947_s26 + $0x18] sm:$0xff] %v2436_v35  }
 0x357   : > { %2579 = vst [vmem:[%s3947_s26 + $0x10] sm:$0xff] %v2431_v36  }
 0x358   : > { %v2915_v39 = vpop.f32.mrb[40].mxu0 }
 0x359   : > { %v1551_v40 = vpop.f32.mrb[41].mxu0  ;;  %v1560_v44 = vadd.f32 %v2915_v39, %v3939_v28 }
 0x35a   : > { %v2916_v42 = vpop.f32.mrb[42].mxu0  ;;  %v1552_v48 = vadd.f32 %v3939_v28, %v1551_v40 }
 0x35b   : > { %v1563_v45 = vadd.f32 %v2916_v42, %v3939_v28  ;;  %v1554_v47 = vpop.f32.mrb[43].mxu0 }
 0x35c   : > { %v1555_v52 = vadd.f32 %v3939_v28, %v1554_v47 }
 0x35d   : > { %v2446_v54 = vpack.c.bf16 %v1563_v45, %v1560_v44 }
 0x35e   : > { %v2441_v60 = vpack.c.bf16 %v1555_v52, %v1552_v48 }
 0x35f   : > { %2582 = vst [vmem:[%s3947_s26 + $0x28] sm:$0xff] %v2446_v54  }
 0x360   : > { %2581 = vst [vmem:[%s3947_s26 + $0x20] sm:$0xff] %v2441_v60   ;;  %v2919_v0 = vpop.f32.mrb[44].mxu0 }
 0x361   : > { %v1567_v3 = vpop.f32.mrb[45].mxu0  ;;  %v1576_v8 = vadd.f32 %v2919_v0, %v3939_v28 }
 0x362   : > { %v2920_v6 = vpop.f32.mrb[46].mxu0  ;;  %v1568_v14 = vadd.f32 %v3939_v28, %v1567_v3 }
 0x363   : > { %v1579_v10 = vadd.f32 %v2920_v6, %v3939_v28  ;;  %v1570_v13 = vpop.f32.mrb[47].mxu0 }
 0x364   : > { %v1571_v19 = vadd.f32 %v3939_v28, %v1570_v13 }
 0x365   : > { %v2456_v23 = vpack.c.bf16 %v1579_v10, %v1576_v8 }
 0x366   : > { %v2451_v26 = vpack.c.bf16 %v1571_v19, %v1568_v14 }
 0x367   : > { %2584 = vst [vmem:[%s3947_s26 + $0x38] sm:$0xff] %v2456_v23  }
 0x368   : > { %2583 = vst [vmem:[%s3947_s26 + $0x30] sm:$0xff] %v2451_v26   ;;  %v2923_v27 = vpop.f32.mrb[48].mxu0 }
 0x369   : > { %v1583_v29 = vpop.f32.mrb[49].mxu0  ;;  %v1592_v51 = vadd.f32 %v2923_v27, %v3939_v28 }
 0x36a   : > { %v2924_v30 = vpop.f32.mrb[50].mxu0  ;;  %v1584_v53 = vadd.f32 %v3939_v28, %v1583_v29 }
 0x36b   : > { %v1595_v57 = vadd.f32 %v2924_v30, %v3939_v28  ;;  %v1586_v49 = vpop.f32.mrb[51].mxu0 }
 0x36c   : > { %v1587_v56 = vadd.f32 %v3939_v28, %v1586_v49 }
 0x36d   : > { %v2466_v59 = vpack.c.bf16 %v1595_v57, %v1592_v51 }
 0x36e   : > { %v2461_v61 = vpack.c.bf16 %v1587_v56, %v1584_v53 }
 0x36f   : > { %2586 = vst [vmem:[%s3947_s26 + $0x48] sm:$0xff] %v2466_v59  }
 0x370   : > { %2585 = vst [vmem:[%s3947_s26 + $0x40] sm:$0xff] %v2461_v61   ;;  %v2927_v63 = vpop.f32.mrb[52].mxu0 }
 0x371   : > { %v1599_v1 = vpop.f32.mrb[53].mxu0  ;;  %v1608_v5 = vadd.f32 %v2927_v63, %v3939_v28 }
 0x372   : > { %v2928_v4 = vpop.f32.mrb[54].mxu0  ;;  %v1600_v15 = vadd.f32 %v3939_v28, %v1599_v1 }
 0x373   : > { %v1611_v9 = vadd.f32 %v2928_v4, %v3939_v28  ;;  %v1602_v12 = vpop.f32.mrb[55].mxu0 }
 0x374   : > { %v1603_v18 = vadd.f32 %v3939_v28, %v1602_v12 }
 0x375   : > { %v2476_v21 = vpack.c.bf16 %v1611_v9, %v1608_v5 }
 0x376   : > { %v2471_v22 = vpack.c.bf16 %v1603_v18, %v1600_v15 }
 0x377   : > { %2588 = vst [vmem:[%s3947_s26 + $0x58] sm:$0xff] %v2476_v21  }
 0x378   : > { %2587 = vst [vmem:[%s3947_s26 + $0x50] sm:$0xff] %v2471_v22   ;;  %v2931_v25 = vpop.f32.mrb[56].mxu0 }
 0x379   : > { %v1615_v31 = vpop.f32.mrb[57].mxu0  ;;  %v1624_v37 = vadd.f32 %v2931_v25, %v3939_v28 }
 0x37a   : > { %v2932_v34 = vpop.f32.mrb[58].mxu0  ;;  %v1616_v43 = vadd.f32 %v3939_v28, %v1615_v31 }
 0x37b   : > { %v1627_v38 = vadd.f32 %v2932_v34, %v3939_v28  ;;  %v1618_v41 = vpop.f32.mrb[59].mxu0 }
 0x37c   : > { %v1619_v46 = vadd.f32 %v3939_v28, %v1618_v41 }
 0x37d   : > { %v2486_v50 = vpack.c.bf16 %v1627_v38, %v1624_v37 }
 0x37e   : > { %v2481_v55 = vpack.c.bf16 %v1619_v46, %v1616_v43 }
 0x37f   : > { %2590 = vst [vmem:[%s3947_s26 + $0x68] sm:$0xff] %v2486_v50  }
 0x380   : > { %2589 = vst [vmem:[%s3947_s26 + $0x60] sm:$0xff] %v2481_v55   ;;  %v2935_v58 = vpop.f32.mrb[60].mxu0 }
 0x381   : > { %v1631_v62 = vpop.f32.mrb[61].mxu0  ;;  %v1640_v7 = vadd.f32 %v2935_v58, %v3939_v28 }
 0x382   : > { %v2936_v2 = vpop.f32.mrb[62].mxu0  ;;  %v1632_v17 = vadd.f32 %v3939_v28, %v1631_v62 }
 0x383   : > { %v1643_v11 = vadd.f32 %v2936_v2, %v3939_v28  ;;  %v1634_v16 = vpop.f32.mrb[63].mxu0 }
 0x384   : > { %v1635_v20 = vadd.f32 %v3939_v28, %v1634_v16 }
 0x385   : > { %v2496_v24 = vpack.c.bf16 %v1643_v11, %v1640_v7 }
 0x386   : > { %v2491_v32 = vpack.c.bf16 %v1635_v20, %v1632_v17 }
 0x387   : > { %2592 = vst [vmem:[%s3947_s26 + $0x78] sm:$0xff] %v2496_v24  }
 0x388   : > { %2591 = vst [vmem:[%s3947_s26 + $0x70] sm:$0xff] %v2491_v32   ;;  %v2939_v33 = vpop.f32.mrb[64].mxu0 }
 0x389   : > { %v1647_v35 = vpop.f32.mrb[65].mxu0  ;;  %v1656_v39 = vadd.f32 %v2939_v33, %v3939_v28 }
 0x38a   : > { %v2940_v36 = vpop.f32.mrb[66].mxu0  ;;  %v1648_v44 = vadd.f32 %v3939_v28, %v1647_v35 }
 0x38b   : > { %v1659_v40 = vadd.f32 %v2940_v36, %v3939_v28  ;;  %v1650_v42 = vpop.f32.mrb[67].mxu0 }
 0x38c   : > { %v1651_v45 = vadd.f32 %v3939_v28, %v1650_v42 }
 0x38d   : > { %v2506_v47 = vpack.c.bf16 %v1659_v40, %v1656_v39 }
 0x38e   : > { %v2501_v48 = vpack.c.bf16 %v1651_v45, %v1648_v44 }
 0x38f   : > { %2594 = vst [vmem:[%s3947_s26 + $0x88] sm:$0xff] %v2506_v47  }
 0x390   : > { %2593 = vst [vmem:[%s3947_s26 + $0x80] sm:$0xff] %v2501_v48   ;;  %v2943_v52 = vpop.f32.mrb[68].mxu0 }
 0x391   : > { %v1663_v54 = vpop.f32.mrb[69].mxu0  ;;  %v1672_v0 = vadd.f32 %v2943_v52, %v3939_v28 }
 0x392   : > { %v2944_v60 = vpop.f32.mrb[70].mxu0  ;;  %v1664_v8 = vadd.f32 %v3939_v28, %v1663_v54 }
 0x393   : > { %v1675_v3 = vadd.f32 %v2944_v60, %v3939_v28  ;;  %v1666_v6 = vpop.f32.mrb[71].mxu0 }
 0x394   : > { %v1667_v10 = vadd.f32 %v3939_v28, %v1666_v6 }
 0x395   : > { %v2516_v13 = vpack.c.bf16 %v1675_v3, %v1672_v0 }
 0x396   : > { %v2511_v14 = vpack.c.bf16 %v1667_v10, %v1664_v8 }
 0x397   : > { %2596 = vst [vmem:[%s3947_s26 + $0x98] sm:$0xff] %v2516_v13  }
 0x398   : > { %2595 = vst [vmem:[%s3947_s26 + $0x90] sm:$0xff] %v2511_v14   ;;  %v2947_v19 = vpop.f32.mrb[72].mxu0 }
 0x399   : > { %v1679_v23 = vpop.f32.mrb[73].mxu0  ;;  %v1688_v27 = vadd.f32 %v2947_v19, %v3939_v28 }
 0x39a   : > { %v2948_v26 = vpop.f32.mrb[74].mxu0  ;;  %v1680_v51 = vadd.f32 %v3939_v28, %v1679_v23 }
 0x39b   : > { %v1691_v29 = vadd.f32 %v2948_v26, %v3939_v28  ;;  %v1682_v30 = vpop.f32.mrb[75].mxu0 }
 0x39c   : > { %v1683_v57 = vadd.f32 %v3939_v28, %v1682_v30 }
 0x39d   : > { %v2526_v49 = vpack.c.bf16 %v1691_v29, %v1688_v27 }
 0x39e   : > { %v2521_v53 = vpack.c.bf16 %v1683_v57, %v1680_v51 }
 0x39f   : > { %2598 = vst [vmem:[%s3947_s26 + $0xa8] sm:$0xff] %v2526_v49  }
 0x3a0   : > { %2597 = vst [vmem:[%s3947_s26 + $0xa0] sm:$0xff] %v2521_v53   ;;  %v2951_v56 = vpop.f32.mrb[76].mxu0 }
 0x3a1   : > { %v1695_v59 = vpop.f32.mrb[77].mxu0  ;;  %v1704_v63 = vadd.f32 %v2951_v56, %v3939_v28 }
 0x3a2   : > { %v2952_v61 = vpop.f32.mrb[78].mxu0  ;;  %v1696_v5 = vadd.f32 %v3939_v28, %v1695_v59 }
 0x3a3   : > { %v1707_v1 = vadd.f32 %v2952_v61, %v3939_v28  ;;  %v1698_v4 = vpop.f32.mrb[79].mxu0 }
 0x3a4   : > { %v1699_v9 = vadd.f32 %v3939_v28, %v1698_v4 }
 0x3a5   : > { %v2536_v12 = vpack.c.bf16 %v1707_v1, %v1704_v63 }
 0x3a6   : > { %v2531_v15 = vpack.c.bf16 %v1699_v9, %v1696_v5 }
 0x3a7   : > { %2600 = vst [vmem:[%s3947_s26 + $0xb8] sm:$0xff] %v2536_v12  }
 0x3a8   : > { %2599 = vst [vmem:[%s3947_s26 + $0xb0] sm:$0xff] %v2531_v15   ;;  %v2955_v18 = vpop.f32.mrb[80].mxu0 }
 0x3a9   : > { %v1711_v21 = vpop.f32.mrb[81].mxu0  ;;  %v1720_v25 = vadd.f32 %v2955_v18, %v3939_v28 }
 0x3aa   : > { %v2956_v22 = vpop.f32.mrb[82].mxu0  ;;  %v1712_v37 = vadd.f32 %v3939_v28, %v1711_v21 }
 0x3ab   : > { %v1723_v31 = vadd.f32 %v2956_v22, %v3939_v28  ;;  %v1714_v34 = vpop.f32.mrb[83].mxu0 }
 0x3ac   : > { %v1715_v38 = vadd.f32 %v3939_v28, %v1714_v34 }
 0x3ad   : > { %v2546_v41 = vpack.c.bf16 %v1723_v31, %v1720_v25 }
 0x3ae   : > { %v2541_v43 = vpack.c.bf16 %v1715_v38, %v1712_v37 }
 0x3af   : > { %2602 = vst [vmem:[%s3947_s26 + $0xc8] sm:$0xff] %v2546_v41  }
 0x3b0   : > { %2601 = vst [vmem:[%s3947_s26 + $0xc0] sm:$0xff] %v2541_v43   ;;  %v2959_v46 = vpop.f32.mrb[84].mxu0 }
 0x3b1   : > { %v1727_v50 = vpop.f32.mrb[85].mxu0  ;;  %v1736_v58 = vadd.f32 %v2959_v46, %v3939_v28 }
 0x3b2   : > { %v2960_v55 = vpop.f32.mrb[86].mxu0  ;;  %v1728_v7 = vadd.f32 %v3939_v28, %v1727_v50 }
 0x3b3   : > { %v1739_v62 = vadd.f32 %v2960_v55, %v3939_v28  ;;  %v1730_v2 = vpop.f32.mrb[87].mxu0 }
 0x3b4   : > { %v1731_v11 = vadd.f32 %v3939_v28, %v1730_v2 }
 0x3b5   : > { %v2556_v16 = vpack.c.bf16 %v1739_v62, %v1736_v58 }
 0x3b6   : > { %v2551_v17 = vpack.c.bf16 %v1731_v11, %v1728_v7 }
 0x3b7   : > { %2604 = vst [vmem:[%s3947_s26 + $0xd8] sm:$0xff] %v2556_v16  }
 0x3b8   : > { %2603 = vst [vmem:[%s3947_s26 + $0xd0] sm:$0xff] %v2551_v17   ;;  %v2963_v20 = vpop.f32.mrb[88].mxu0 }
 0x3b9   : > { %v1743_v24 = vpop.f32.mrb[89].mxu0  ;;  %v1752_v33 = vadd.f32 %v2963_v20, %v3939_v28 }
 0x3ba   : > { %v2964_v32 = vpop.f32.mrb[90].mxu0  ;;  %v1744_v39 = vadd.f32 %v3939_v28, %v1743_v24 }
 0x3bb   : > { %v1755_v35 = vadd.f32 %v2964_v32, %v3939_v28  ;;  %v1746_v36 = vpop.f32.mrb[91].mxu0 }
 0x3bc   : > { %v1747_v40 = vadd.f32 %v3939_v28, %v1746_v36 }
 0x3bd   : > { %v2566_v42 = vpack.c.bf16 %v1755_v35, %v1752_v33 }
 0x3be   : > { %v2561_v44 = vpack.c.bf16 %v1747_v40, %v1744_v39 }
 0x3bf   : > { %2606 = vst [vmem:[%s3947_s26 + $0xe8] sm:$0xff] %v2566_v42  }
 0x3c0   : > { %2605 = vst [vmem:[%s3947_s26 + $0xe0] sm:$0xff] %v2561_v44   ;;  %v2967_v45 = vpop.f32.mrb[92].mxu0 }
 0x3c1   : > { %v1759_v47 = vpop.f32.mrb[93].mxu0  ;;  %v1768_v52 = vadd.f32 %v2967_v45, %v3939_v28 }
 0x3c2   : > { %v2968_v48 = vpop.f32.mrb[94].mxu0  ;;  %v1760_v0 = vadd.f32 %v3939_v28, %v1759_v47 }
 0x3c3   : > { %v1771_v54 = vadd.f32 %v2968_v48, %v3939_v28  ;;  %v1762_v60 = vpop.f32.mrb[95].mxu0 }
 0x3c4   : > { %v1763_v3 = vadd.f32 %v3939_v28, %v1762_v60 }
 0x3c5   : > { %v2576_v6 = vpack.c.bf16 %v1771_v54, %v1768_v52 }
 0x3c6   : > { %v2571_v8 = vpack.c.bf16 %v1763_v3, %v1760_v0 }
 0x3c7   : > { %2608 = vst [vmem:[%s3947_s26 + $0xf8] sm:$0xff] %v2576_v6  }
 0x3c8   : > { %2607 = vst [vmem:[%s3947_s26 + $0xf0] sm:$0xff] %v2571_v8  }
 0x3c9   : > { %3377 = shalt.err (!%p3374_p4)
}
 0x3ca   : > { %s3378_s27 = scalar_lea.hbm %s4044_s12, 4096  ;;  %s3382_s9 = scalar_lea.hbm %s4098_s6, 8192 }
 0x3cb   : > { %p3379_p9 = scmp.ne.s32.totalorder %s4044_s12, %s3378_s27  ;;  %p3383_p8 = scmp.lt.u32.totalorder %s4044_s12, %s4098_s6 }
 0x3cc   : > { %p3384_p13 = scmp.lt.u32.totalorder %s3382_s9, %s3378_s27  ;;  %p3386_p10 = scmp.lt.u32.totalorder %s3378_s27, %s4044_s12 }
 0x3cd   : > { %p3380_p0 = pnand %p3379_p9, %p3638_p5 }
 0x3ce   : > { %p3385_p6 = por %p3384_p13, %p3383_p8 }
 0x3cf   : > { %p3381_p11 = pneg %p3380_p0 }
 0x3d0   : > { %p3387_p3 = por %p3386_p10, %p3385_p6 }
 0x3d2   : > { %p3388_p7 = pnand %p3387_p3, %p3381_p11 }
 0x3d4   : > { %3391 = shalt.err (!%p3388_p7)
}
 0x3d5   : > { %s3447_s16 = smov 64   ;;  %s3448_s17 = smov 4  }
 0x3d6   : > { %2999 = dma.vmem_to_hbm [thread:$0]  (%p3638_p5), %s4046_s8, 4096, %s4044_s12, %s2095_s25, %s3447_s16, %s3447_s16, %s3448_s17  }
 0x3d7 PF: > { %s2123_s20 = sand.u32 1, %s3426_s21   ;;  %p4116_p12 = scmp.ne.s32.totalorder %s4103_s28, 0 }
 0x3d8   : > { %p4117_p1 = scmp.ge.s32.totalorder %s3438_s24, 2  ;;  %s2124_s19 = scalar_lea.sflag [#allocation4], %s2123_s20 }
 0x3da   : > { %p3016_p2 = pnand %p4117_p1, %p4116_p12 }
 0x3dc   : > { %3421 = dma.done.wait (!%p3016_p2), %s2124_s19, 4096  }
 0x3dd   : > { %3423 = vsyncadd (!%p3016_p2), %s2124_s19, 4294963200  ;;  %p21_p4 = scmp.ge.s32.totalorder %s3624_s18, 4   ;;  %s4118_s21 = smov %s3430_s22 }
 0x3de   : > { %s4119_s22 = smov %s3434_s23  ;;  %s4120_s23 = smov %s3634_s14 }
 0x3df   : > { %s4121_s24 = smov %s3624_s18  ;;  %23 = sbr.rel (!%p21_p4) target bundleno = 7 (0x7), region = 101 }
 0x3e6   :  { %2129 = vsyncpa [#allocation3], 1 }
 0x3e7   :  { %2131 = vsyncpa [#allocation3 + $0x1], 1 }
 0x3e8   :  { %2132 = vsyncpa [#allocation6], 1 }
 0x3e9   :  { %2133 = vsyncpa [#allocation9], 1 }
 0x3ea   :  { %2134 = vsyncpa [#allocation4], 1 }
 0x3eb   :  { %2136 = vsyncpa [#allocation4 + $0x1], 1 }

</bundles_post_ra>
